<compile_context>
chip_gen: v6e
topology: v6e:2x2x1
jax: 0.10.0
libtpu: 0.0.40
codegen_flags: <defaults>
</compile_context>

<pallas_src>
import functools

import jax
import jax.numpy as jnp
from jax.experimental import pallas as pl
from jax.experimental.pallas import tpu as pltpu


def _round_up(n, m):
    return ((n + m - 1) // m) * m


def _ffn_pos_kernel(x_ref, w1_ref, b1_ref, w2t_ref, b2_ref, pos_ref,
                    gamma_ref, beta_ref, wout_ref, bout_ref, o_ref,
                    *, n_features, eps):
    """One batch tile, batch on the lane axis.

    x_ref     : (F, TB)   transposed input tile
    w1_ref    : (H, 1)    Linear(1, H) weight (column)
    b1_ref    : (H, 1)
    w2t_ref   : (D, H)    Linear(H, D) weight, laid out for (D,H)@(H,TB)
    b2_ref    : (D, 1)
    pos_ref   : (D, F)    positional embedding, transposed
    gamma_ref : (D, 1)    LayerNorm scale
    beta_ref  : (D, 1)    LayerNorm shift
    wout_ref  : (D, F)    output weight reshaped (F, D) then transposed
    bout_ref  : (1, 1)    output bias
    o_ref     : (1, TB)   lane-dense per-row output
    """
    x = x_ref[...]            # (F, TB)
    w1 = w1_ref[...]          # (H, 1)
    b1 = b1_ref[...]          # (H, 1)
    w2t = w2t_ref[...]        # (D, H)
    b2 = b2_ref[...]          # (D, 1)
    pos = pos_ref[...]        # (D, F)
    gamma = gamma_ref[...]    # (D, 1)
    beta = beta_ref[...]      # (D, 1)
    wout = wout_ref[...]      # (D, F)
    bout = bout_ref[0, 0]

    tb = x.shape[1]
    acc = jnp.zeros((1, tb), dtype=jnp.float32)

    # n_features is small and static -> unrolled Python loop; everything stays
    # 2-D with batch lane-dense.
    for f in range(n_features):
        xf = x[f:f + 1, :]                                    # (1, TB)
        # Linear(1, H) + ReLU:  (H,1)*(1,TB) broadcast -> (H, TB)
        h = jnp.maximum(w1 * xf + b1, 0.0)
        # Linear(H, D):  (D,H)@(H,TB) on the MXU -> (D, TB)
        e = jnp.dot(w2t, h, preferred_element_type=jnp.float32)
        e = e + b2 + pos[:, f:f + 1]                          # + bias + pos emb
        # LayerNorm over embed_dim (sublane axis), biased variance like PyTorch.
        mean = jnp.mean(e, axis=0, keepdims=True)             # (1, TB)
        cen = e - mean
        var = jnp.mean(cen * cen, axis=0, keepdims=True)
        ln = cen * jax.lax.rsqrt(var + eps) * gamma + beta    # (D, TB)
        # Contribution of this feature block to Linear(F*D, 1).
        acc = acc + jnp.sum(ln * wout[:, f:f + 1], axis=0, keepdims=True)

    o_ref[...] = (acc + bout).astype(o_ref.dtype)


def ffn_with_pos_encoding(x, params, *, tile_b=512):
    """Pallas forward of FFNWithPosEncoding.

    x: (B, n_features) float32
    params: (w1 (H,), b1 (H,), w2 (H, D), b2 (D,), pos (F, D),
             gamma (D,), beta (D,), wout (F*D,), bout (1,))
    returns: (B, 1) float32
    """
    w1, b1, w2, b2, pos, gamma, beta, wout, bout = params
    B, F = x.shape
    H = w1.shape[0]
    D = w2.shape[1]

    # Tile the batch on the lane axis; tiles must be multiples of 128.
    tile_b = max(128, min(_round_up(tile_b, 128), _round_up(B, 128)))
    b_pad = _round_up(B, tile_b)
    num_tiles = b_pad // tile_b

    x_p = jnp.pad(x, ((0, b_pad - B), (0, 0))) if b_pad != B else x
    # TODO(synk): ideally the producer emits x already transposed (F, B).
    x_t = x_p.T                                  # (F, b_pad)

    # Parameter layout plumbing (tiny, one-time, outside the hot loop).
    w1c = w1.reshape(H, 1)
    b1c = b1.reshape(H, 1)
    w2t = w2.T                                   # (D, H)
    b2c = b2.reshape(D, 1)
    pos_t = pos.T                                # (D, F)
    gc = gamma.reshape(D, 1)
    bc = beta.reshape(D, 1)
    wout_t = wout.reshape(F, D).T                # (D, F); col f = wout[f*D:(f+1)*D]
    boutc = bout.reshape(1, 1)

    kernel = functools.partial(_ffn_pos_kernel, n_features=F, eps=1e-5)

    const = lambda i: (0, 0)   # resident parameter blocks (fetched once)
    out = pl.pallas_call(
        kernel,
        out_shape=jax.ShapeDtypeStruct((1, b_pad), x.dtype),
        grid=(num_tiles,),
        in_specs=[
            pl.BlockSpec((F, tile_b), lambda i: (0, i)),   # x tile (pipelined)
            pl.BlockSpec((H, 1), const),                   # w1
            pl.BlockSpec((H, 1), const),                   # b1
            pl.BlockSpec((D, H), const),                   # w2^T
            pl.BlockSpec((D, 1), const),                   # b2
            pl.BlockSpec((D, F), const),                   # pos^T
            pl.BlockSpec((D, 1), const),                   # gamma
            pl.BlockSpec((D, 1), const),                   # beta
            pl.BlockSpec((D, F), const),                   # wout^T
            pl.BlockSpec((1, 1), const),                   # bout
        ],
        out_specs=pl.BlockSpec((1, tile_b), lambda i: (0, i)),
        compiler_params=pltpu.CompilerParams(
            dimension_semantics=("parallel",),
            vmem_limit_bytes=32 * 1024 * 1024,
        ),
    )(x_t, w1c, b1c, w2t, b2c, pos_t, gc, bc, wout_t, boutc)

    return out[0, :B].reshape(B, 1)


def ffn_with_pos_encoding_ref(x, params):
    """Pure-JAX reference mirroring the PyTorch forward (dropout = identity)."""
    w1, b1, w2, b2, pos, gamma, beta, wout, bout = params
    B, F = x.shape
    h = jax.nn.relu(x[:, :, None] * w1 + b1)                        # (B, F, H)
    e = jnp.einsum('bfh,hd->bfd', h, w2, precision='highest') + b2  # (B, F, D)
    e = e + pos[None, :, :]
    mean = e.mean(-1, keepdims=True)
    var = ((e - mean) ** 2).mean(-1, keepdims=True)
    ln = (e - mean) * jax.lax.rsqrt(var + 1e-5) * gamma + beta
    flat = ln.reshape(B, -1)                                        # (B, F*D)
    return jnp.dot(flat, wout[:, None], precision='highest') + bout  # (B, 1)


if __name__ == "__main__":
    n_features = 8
    embed_dim = 32        # module's embed_dim
    ff_dim = 32           # module's ff_dim
    batch = 300           # pads to 384 -> grid of 3 tiles of 128

    key = jax.random.PRNGKey(0)
    ks = jax.random.split(key, 8)
    w1 = 0.5 * jax.random.normal(ks[0], (ff_dim,), jnp.float32)
    b1 = 0.1 * jax.random.normal(ks[1], (ff_dim,), jnp.float32)
    w2 = jax.random.normal(ks[2], (ff_dim, embed_dim), jnp.float32) / jnp.sqrt(ff_dim)
    b2 = 0.1 * jax.random.normal(ks[3], (embed_dim,), jnp.float32)
    pos = jax.random.normal(ks[4], (n_features, embed_dim), jnp.float32)
    gamma = jnp.ones((embed_dim,), jnp.float32)
    beta = jnp.zeros((embed_dim,), jnp.float32)
    wout = 0.05 * jax.random.normal(ks[5], (n_features * embed_dim,), jnp.float32)
    bout = jnp.zeros((1,), jnp.float32)
    params = (w1, b1, w2, b2, pos, gamma, beta, wout, bout)

    x = jax.random.normal(ks[6], (batch, n_features), jnp.float32)

    out = ffn_with_pos_encoding(x, params, tile_b=128)
    out = jax.block_until_ready(out)

    ref = ffn_with_pos_encoding_ref(x, params)
    assert out.shape == (batch, 1), out.shape
    # f32 MXU matmul vs XLA reference: allow small rounding differences.
    assert jnp.allclose(out, ref, atol=5e-3, rtol=5e-3), (
        float(jnp.max(jnp.abs(out - ref))))

    print("KERNEL_OK")
</pallas_src>

<mosaic_0001>
module attributes {stable_mosaic.version = 11 : i64} {
  func.func @_ffn_pos_kernel(%arg0: i32, %arg1: memref<8x128xf32, #tpu.memory_space<vmem>>, %arg2: memref<32x1xf32, #tpu.memory_space<vmem>>, %arg3: memref<32x1xf32, #tpu.memory_space<vmem>>, %arg4: memref<32x32xf32, #tpu.memory_space<vmem>>, %arg5: memref<32x1xf32, #tpu.memory_space<vmem>>, %arg6: memref<32x8xf32, #tpu.memory_space<vmem>>, %arg7: memref<32x1xf32, #tpu.memory_space<vmem>>, %arg8: memref<32x1xf32, #tpu.memory_space<vmem>>, %arg9: memref<32x8xf32, #tpu.memory_space<vmem>>, %arg10: memref<1x1xf32, #tpu.memory_space<vmem>>, %arg11: memref<1x128xf32, #tpu.memory_space<vmem>>) attributes {dimension_semantics = [#tpu.dimension_semantics<parallel>], iteration_bounds = array<i64: 3>, scalar_prefetch = 0 : i64, scratch_operands = 0 : i64, tpu.core_type = #tpu.core_type<tc>, window_params = [{transform_indices = @transform_0, window_bounds = array<i64: 8, 128>}, {pipeline_mode = #tpu.pipeline_mode<synchronous>, transform_indices = @transform_1, window_bounds = array<i64: 32, 1>}, {pipeline_mode = #tpu.pipeline_mode<synchronous>, transform_indices = @transform_2, window_bounds = array<i64: 32, 1>}, {pipeline_mode = #tpu.pipeline_mode<synchronous>, transform_indices = @transform_3, window_bounds = array<i64: 32, 32>}, {pipeline_mode = #tpu.pipeline_mode<synchronous>, transform_indices = @transform_4, window_bounds = array<i64: 32, 1>}, {pipeline_mode = #tpu.pipeline_mode<synchronous>, transform_indices = @transform_5, window_bounds = array<i64: 32, 8>}, {pipeline_mode = #tpu.pipeline_mode<synchronous>, transform_indices = @transform_6, window_bounds = array<i64: 32, 1>}, {pipeline_mode = #tpu.pipeline_mode<synchronous>, transform_indices = @transform_7, window_bounds = array<i64: 32, 1>}, {pipeline_mode = #tpu.pipeline_mode<synchronous>, transform_indices = @transform_8, window_bounds = array<i64: 32, 8>}, {pipeline_mode = #tpu.pipeline_mode<synchronous>, transform_indices = @transform_9, window_bounds = array<i64: 1, 1>}, {transform_indices = @transform_10, window_bounds = array<i64: 1, 128>}]} {
    %c0 = arith.constant 0 : index
    %c0_0 = arith.constant 0 : index
    %0 = vector.load %arg1[%c0, %c0_0] : memref<8x128xf32, #tpu.memory_space<vmem>>, vector<8x128xf32>
    %c0_1 = arith.constant 0 : index
    %c0_2 = arith.constant 0 : index
    %1 = vector.load %arg2[%c0_1, %c0_2] : memref<32x1xf32, #tpu.memory_space<vmem>>, vector<32x1xf32>
    %c0_3 = arith.constant 0 : index
    %c0_4 = arith.constant 0 : index
    %2 = vector.load %arg3[%c0_3, %c0_4] : memref<32x1xf32, #tpu.memory_space<vmem>>, vector<32x1xf32>
    %c0_5 = arith.constant 0 : index
    %c0_6 = arith.constant 0 : index
    %3 = vector.load %arg4[%c0_5, %c0_6] : memref<32x32xf32, #tpu.memory_space<vmem>>, vector<32x32xf32>
    %c0_7 = arith.constant 0 : index
    %c0_8 = arith.constant 0 : index
    %4 = vector.load %arg5[%c0_7, %c0_8] : memref<32x1xf32, #tpu.memory_space<vmem>>, vector<32x1xf32>
    %c0_9 = arith.constant 0 : index
    %c0_10 = arith.constant 0 : index
    %5 = vector.load %arg6[%c0_9, %c0_10] : memref<32x8xf32, #tpu.memory_space<vmem>>, vector<32x8xf32>
    %c0_11 = arith.constant 0 : index
    %c0_12 = arith.constant 0 : index
    %6 = vector.load %arg7[%c0_11, %c0_12] : memref<32x1xf32, #tpu.memory_space<vmem>>, vector<32x1xf32>
    %c0_13 = arith.constant 0 : index
    %c0_14 = arith.constant 0 : index
    %7 = vector.load %arg8[%c0_13, %c0_14] : memref<32x1xf32, #tpu.memory_space<vmem>>, vector<32x1xf32>
    %c0_15 = arith.constant 0 : index
    %c0_16 = arith.constant 0 : index
    %8 = vector.load %arg9[%c0_15, %c0_16] : memref<32x8xf32, #tpu.memory_space<vmem>>, vector<32x8xf32>
    %c0_17 = arith.constant 0 : index
    %c0_18 = arith.constant 0 : index
    %9 = vector.load %arg10[%c0_17, %c0_18] : memref<1x1xf32, #tpu.memory_space<vmem>>, vector<1x1xf32>
    %10 = vector.extract %9[0, 0] : f32 from vector<1x1xf32>
    %cst = arith.constant 0.000000e+00 : f32
    %11 = vector.broadcast %cst : f32 to vector<1x128xf32>
    %12 = vector.extract_strided_slice %0 {offsets = [0, 0], sizes = [1, 128], strides = [1, 1]} : vector<8x128xf32> to vector<1x128xf32>
    %13 = vector.broadcast %1 : vector<32x1xf32> to vector<32x128xf32>
    %14 = vector.broadcast %12 : vector<1x128xf32> to vector<32x128xf32>
    %15 = arith.mulf %13, %14 : vector<32x128xf32>
    %16 = vector.broadcast %2 : vector<32x1xf32> to vector<32x128xf32>
    %17 = arith.addf %15, %16 : vector<32x128xf32>
    %cst_19 = arith.constant 0.000000e+00 : f32
    %18 = vector.broadcast %cst_19 : f32 to vector<32x128xf32>
    %19 = arith.maximumf %17, %18 : vector<32x128xf32>
    %cst_20 = arith.constant dense<0.000000e+00> : vector<32x128xf32>
    %20 = tpu.matmul %3, %19, %cst_20 {dimension_numbers = #tpu.dot_dimension_numbers<[1], [0], [0], [1], [0, 0, 1, 1], [], []>} : vector<32x32xf32>, vector<32x128xf32>, vector<32x128xf32> -> vector<32x128xf32>
    %21 = vector.broadcast %4 : vector<32x1xf32> to vector<32x128xf32>
    %22 = arith.addf %20, %21 : vector<32x128xf32>
    %23 = vector.extract_strided_slice %5 {offsets = [0, 0], sizes = [32, 1], strides = [1, 1]} : vector<32x8xf32> to vector<32x1xf32>
    %24 = vector.broadcast %23 : vector<32x1xf32> to vector<32x128xf32>
    %25 = arith.addf %22, %24 : vector<32x128xf32>
    %cst_21 = arith.constant dense<0.000000e+00> : vector<128xf32>
    %26 = vector.multi_reduction <add>, %25, %cst_21 [0] : vector<32x128xf32> to vector<128xf32>
    %27 = vector.shape_cast %26 : vector<128xf32> to vector<1x128xf32>
    %cst_22 = arith.constant 3.200000e+01 : f32
    %28 = vector.broadcast %cst_22 : f32 to vector<1x128xf32>
    %29 = arith.divf %27, %28 : vector<1x128xf32>
    %30 = vector.broadcast %29 : vector<1x128xf32> to vector<32x128xf32>
    %31 = arith.subf %25, %30 : vector<32x128xf32>
    %32 = arith.mulf %31, %31 : vector<32x128xf32>
    %cst_23 = arith.constant dense<0.000000e+00> : vector<128xf32>
    %33 = vector.multi_reduction <add>, %32, %cst_23 [0] : vector<32x128xf32> to vector<128xf32>
    %34 = vector.shape_cast %33 : vector<128xf32> to vector<1x128xf32>
    %cst_24 = arith.constant 3.200000e+01 : f32
    %35 = vector.broadcast %cst_24 : f32 to vector<1x128xf32>
    %36 = arith.divf %34, %35 : vector<1x128xf32>
    %cst_25 = arith.constant 9.99999974E-6 : f32
    %37 = vector.broadcast %cst_25 : f32 to vector<1x128xf32>
    %38 = arith.addf %36, %37 : vector<1x128xf32>
    %39 = math.rsqrt %38 : vector<1x128xf32>
    %40 = vector.broadcast %39 : vector<1x128xf32> to vector<32x128xf32>
    %41 = arith.mulf %31, %40 : vector<32x128xf32>
    %42 = vector.broadcast %6 : vector<32x1xf32> to vector<32x128xf32>
    %43 = arith.mulf %41, %42 : vector<32x128xf32>
    %44 = vector.broadcast %7 : vector<32x1xf32> to vector<32x128xf32>
    %45 = arith.addf %43, %44 : vector<32x128xf32>
    %46 = vector.extract_strided_slice %8 {offsets = [0, 0], sizes = [32, 1], strides = [1, 1]} : vector<32x8xf32> to vector<32x1xf32>
    %47 = vector.broadcast %46 : vector<32x1xf32> to vector<32x128xf32>
    %48 = arith.mulf %45, %47 : vector<32x128xf32>
    %cst_26 = arith.constant dense<0.000000e+00> : vector<128xf32>
    %49 = vector.multi_reduction <add>, %48, %cst_26 [0] : vector<32x128xf32> to vector<128xf32>
    %50 = vector.shape_cast %49 : vector<128xf32> to vector<1x128xf32>
    %51 = arith.addf %11, %50 : vector<1x128xf32>
    %52 = vector.extract_strided_slice %0 {offsets = [1, 0], sizes = [1, 128], strides = [1, 1]} : vector<8x128xf32> to vector<1x128xf32>
    %53 = vector.broadcast %1 : vector<32x1xf32> to vector<32x128xf32>
    %54 = vector.broadcast %52 : vector<1x128xf32> to vector<32x128xf32>
    %55 = arith.mulf %53, %54 : vector<32x128xf32>
    %56 = vector.broadcast %2 : vector<32x1xf32> to vector<32x128xf32>
    %57 = arith.addf %55, %56 : vector<32x128xf32>
    %cst_27 = arith.constant 0.000000e+00 : f32
    %58 = vector.broadcast %cst_27 : f32 to vector<32x128xf32>
    %59 = arith.maximumf %57, %58 : vector<32x128xf32>
    %cst_28 = arith.constant dense<0.000000e+00> : vector<32x128xf32>
    %60 = tpu.matmul %3, %59, %cst_28 {dimension_numbers = #tpu.dot_dimension_numbers<[1], [0], [0], [1], [0, 0, 1, 1], [], []>} : vector<32x32xf32>, vector<32x128xf32>, vector<32x128xf32> -> vector<32x128xf32>
    %61 = vector.broadcast %4 : vector<32x1xf32> to vector<32x128xf32>
    %62 = arith.addf %60, %61 : vector<32x128xf32>
    %63 = vector.extract_strided_slice %5 {offsets = [0, 1], sizes = [32, 1], strides = [1, 1]} : vector<32x8xf32> to vector<32x1xf32>
    %64 = vector.broadcast %63 : vector<32x1xf32> to vector<32x128xf32>
    %65 = arith.addf %62, %64 : vector<32x128xf32>
    %cst_29 = arith.constant dense<0.000000e+00> : vector<128xf32>
    %66 = vector.multi_reduction <add>, %65, %cst_29 [0] : vector<32x128xf32> to vector<128xf32>
    %67 = vector.shape_cast %66 : vector<128xf32> to vector<1x128xf32>
    %cst_30 = arith.constant 3.200000e+01 : f32
    %68 = vector.broadcast %cst_30 : f32 to vector<1x128xf32>
    %69 = arith.divf %67, %68 : vector<1x128xf32>
    %70 = vector.broadcast %69 : vector<1x128xf32> to vector<32x128xf32>
    %71 = arith.subf %65, %70 : vector<32x128xf32>
    %72 = arith.mulf %71, %71 : vector<32x128xf32>
    %cst_31 = arith.constant dense<0.000000e+00> : vector<128xf32>
    %73 = vector.multi_reduction <add>, %72, %cst_31 [0] : vector<32x128xf32> to vector<128xf32>
    %74 = vector.shape_cast %73 : vector<128xf32> to vector<1x128xf32>
    %cst_32 = arith.constant 3.200000e+01 : f32
    %75 = vector.broadcast %cst_32 : f32 to vector<1x128xf32>
    %76 = arith.divf %74, %75 : vector<1x128xf32>
    %cst_33 = arith.constant 9.99999974E-6 : f32
    %77 = vector.broadcast %cst_33 : f32 to vector<1x128xf32>
    %78 = arith.addf %76, %77 : vector<1x128xf32>
    %79 = math.rsqrt %78 : vector<1x128xf32>
    %80 = vector.broadcast %79 : vector<1x128xf32> to vector<32x128xf32>
    %81 = arith.mulf %71, %80 : vector<32x128xf32>
    %82 = vector.broadcast %6 : vector<32x1xf32> to vector<32x128xf32>
    %83 = arith.mulf %81, %82 : vector<32x128xf32>
    %84 = vector.broadcast %7 : vector<32x1xf32> to vector<32x128xf32>
    %85 = arith.addf %83, %84 : vector<32x128xf32>
    %86 = vector.extract_strided_slice %8 {offsets = [0, 1], sizes = [32, 1], strides = [1, 1]} : vector<32x8xf32> to vector<32x1xf32>
    %87 = vector.broadcast %86 : vector<32x1xf32> to vector<32x128xf32>
    %88 = arith.mulf %85, %87 : vector<32x128xf32>
    %cst_34 = arith.constant dense<0.000000e+00> : vector<128xf32>
    %89 = vector.multi_reduction <add>, %88, %cst_34 [0] : vector<32x128xf32> to vector<128xf32>
    %90 = vector.shape_cast %89 : vector<128xf32> to vector<1x128xf32>
    %91 = arith.addf %51, %90 : vector<1x128xf32>
    %92 = vector.extract_strided_slice %0 {offsets = [2, 0], sizes = [1, 128], strides = [1, 1]} : vector<8x128xf32> to vector<1x128xf32>
    %93 = vector.broadcast %1 : vector<32x1xf32> to vector<32x128xf32>
    %94 = vector.broadcast %92 : vector<1x128xf32> to vector<32x128xf32>
    %95 = arith.mulf %93, %94 : vector<32x128xf32>
    %96 = vector.broadcast %2 : vector<32x1xf32> to vector<32x128xf32>
    %97 = arith.addf %95, %96 : vector<32x128xf32>
    %cst_35 = arith.constant 0.000000e+00 : f32
    %98 = vector.broadcast %cst_35 : f32 to vector<32x128xf32>
    %99 = arith.maximumf %97, %98 : vector<32x128xf32>
    %cst_36 = arith.constant dense<0.000000e+00> : vector<32x128xf32>
    %100 = tpu.matmul %3, %99, %cst_36 {dimension_numbers = #tpu.dot_dimension_numbers<[1], [0], [0], [1], [0, 0, 1, 1], [], []>} : vector<32x32xf32>, vector<32x128xf32>, vector<32x128xf32> -> vector<32x128xf32>
    %101 = vector.broadcast %4 : vector<32x1xf32> to vector<32x128xf32>
    %102 = arith.addf %100, %101 : vector<32x128xf32>
    %103 = vector.extract_strided_slice %5 {offsets = [0, 2], sizes = [32, 1], strides = [1, 1]} : vector<32x8xf32> to vector<32x1xf32>
    %104 = vector.broadcast %103 : vector<32x1xf32> to vector<32x128xf32>
    %105 = arith.addf %102, %104 : vector<32x128xf32>
    %cst_37 = arith.constant dense<0.000000e+00> : vector<128xf32>
    %106 = vector.multi_reduction <add>, %105, %cst_37 [0] : vector<32x128xf32> to vector<128xf32>
    %107 = vector.shape_cast %106 : vector<128xf32> to vector<1x128xf32>
    %cst_38 = arith.constant 3.200000e+01 : f32
    %108 = vector.broadcast %cst_38 : f32 to vector<1x128xf32>
    %109 = arith.divf %107, %108 : vector<1x128xf32>
    %110 = vector.broadcast %109 : vector<1x128xf32> to vector<32x128xf32>
    %111 = arith.subf %105, %110 : vector<32x128xf32>
    %112 = arith.mulf %111, %111 : vector<32x128xf32>
    %cst_39 = arith.constant dense<0.000000e+00> : vector<128xf32>
    %113 = vector.multi_reduction <add>, %112, %cst_39 [0] : vector<32x128xf32> to vector<128xf32>
    %114 = vector.shape_cast %113 : vector<128xf32> to vector<1x128xf32>
    %cst_40 = arith.constant 3.200000e+01 : f32
    %115 = vector.broadcast %cst_40 : f32 to vector<1x128xf32>
    %116 = arith.divf %114, %115 : vector<1x128xf32>
    %cst_41 = arith.constant 9.99999974E-6 : f32
    %117 = vector.broadcast %cst_41 : f32 to vector<1x128xf32>
    %118 = arith.addf %116, %117 : vector<1x128xf32>
    %119 = math.rsqrt %118 : vector<1x128xf32>
    %120 = vector.broadcast %119 : vector<1x128xf32> to vector<32x128xf32>
    %121 = arith.mulf %111, %120 : vector<32x128xf32>
    %122 = vector.broadcast %6 : vector<32x1xf32> to vector<32x128xf32>
    %123 = arith.mulf %121, %122 : vector<32x128xf32>
    %124 = vector.broadcast %7 : vector<32x1xf32> to vector<32x128xf32>
    %125 = arith.addf %123, %124 : vector<32x128xf32>
    %126 = vector.extract_strided_slice %8 {offsets = [0, 2], sizes = [32, 1], strides = [1, 1]} : vector<32x8xf32> to vector<32x1xf32>
    %127 = vector.broadcast %126 : vector<32x1xf32> to vector<32x128xf32>
    %128 = arith.mulf %125, %127 : vector<32x128xf32>
    %cst_42 = arith.constant dense<0.000000e+00> : vector<128xf32>
    %129 = vector.multi_reduction <add>, %128, %cst_42 [0] : vector<32x128xf32> to vector<128xf32>
    %130 = vector.shape_cast %129 : vector<128xf32> to vector<1x128xf32>
    %131 = arith.addf %91, %130 : vector<1x128xf32>
    %132 = vector.extract_strided_slice %0 {offsets = [3, 0], sizes = [1, 128], strides = [1, 1]} : vector<8x128xf32> to vector<1x128xf32>
    %133 = vector.broadcast %1 : vector<32x1xf32> to vector<32x128xf32>
    %134 = vector.broadcast %132 : vector<1x128xf32> to vector<32x128xf32>
    %135 = arith.mulf %133, %134 : vector<32x128xf32>
    %136 = vector.broadcast %2 : vector<32x1xf32> to vector<32x128xf32>
    %137 = arith.addf %135, %136 : vector<32x128xf32>
    %cst_43 = arith.constant 0.000000e+00 : f32
    %138 = vector.broadcast %cst_43 : f32 to vector<32x128xf32>
    %139 = arith.maximumf %137, %138 : vector<32x128xf32>
    %cst_44 = arith.constant dense<0.000000e+00> : vector<32x128xf32>
    %140 = tpu.matmul %3, %139, %cst_44 {dimension_numbers = #tpu.dot_dimension_numbers<[1], [0], [0], [1], [0, 0, 1, 1], [], []>} : vector<32x32xf32>, vector<32x128xf32>, vector<32x128xf32> -> vector<32x128xf32>
    %141 = vector.broadcast %4 : vector<32x1xf32> to vector<32x128xf32>
    %142 = arith.addf %140, %141 : vector<32x128xf32>
    %143 = vector.extract_strided_slice %5 {offsets = [0, 3], sizes = [32, 1], strides = [1, 1]} : vector<32x8xf32> to vector<32x1xf32>
    %144 = vector.broadcast %143 : vector<32x1xf32> to vector<32x128xf32>
    %145 = arith.addf %142, %144 : vector<32x128xf32>
    %cst_45 = arith.constant dense<0.000000e+00> : vector<128xf32>
    %146 = vector.multi_reduction <add>, %145, %cst_45 [0] : vector<32x128xf32> to vector<128xf32>
    %147 = vector.shape_cast %146 : vector<128xf32> to vector<1x128xf32>
    %cst_46 = arith.constant 3.200000e+01 : f32
    %148 = vector.broadcast %cst_46 : f32 to vector<1x128xf32>
    %149 = arith.divf %147, %148 : vector<1x128xf32>
    %150 = vector.broadcast %149 : vector<1x128xf32> to vector<32x128xf32>
    %151 = arith.subf %145, %150 : vector<32x128xf32>
    %152 = arith.mulf %151, %151 : vector<32x128xf32>
    %cst_47 = arith.constant dense<0.000000e+00> : vector<128xf32>
    %153 = vector.multi_reduction <add>, %152, %cst_47 [0] : vector<32x128xf32> to vector<128xf32>
    %154 = vector.shape_cast %153 : vector<128xf32> to vector<1x128xf32>
    %cst_48 = arith.constant 3.200000e+01 : f32
    %155 = vector.broadcast %cst_48 : f32 to vector<1x128xf32>
    %156 = arith.divf %154, %155 : vector<1x128xf32>
    %cst_49 = arith.constant 9.99999974E-6 : f32
    %157 = vector.broadcast %cst_49 : f32 to vector<1x128xf32>
    %158 = arith.addf %156, %157 : vector<1x128xf32>
    %159 = math.rsqrt %158 : vector<1x128xf32>
    %160 = vector.broadcast %159 : vector<1x128xf32> to vector<32x128xf32>
    %161 = arith.mulf %151, %160 : vector<32x128xf32>
    %162 = vector.broadcast %6 : vector<32x1xf32> to vector<32x128xf32>
    %163 = arith.mulf %161, %162 : vector<32x128xf32>
    %164 = vector.broadcast %7 : vector<32x1xf32> to vector<32x128xf32>
    %165 = arith.addf %163, %164 : vector<32x128xf32>
    %166 = vector.extract_strided_slice %8 {offsets = [0, 3], sizes = [32, 1], strides = [1, 1]} : vector<32x8xf32> to vector<32x1xf32>
    %167 = vector.broadcast %166 : vector<32x1xf32> to vector<32x128xf32>
    %168 = arith.mulf %165, %167 : vector<32x128xf32>
    %cst_50 = arith.constant dense<0.000000e+00> : vector<128xf32>
    %169 = vector.multi_reduction <add>, %168, %cst_50 [0] : vector<32x128xf32> to vector<128xf32>
    %170 = vector.shape_cast %169 : vector<128xf32> to vector<1x128xf32>
    %171 = arith.addf %131, %170 : vector<1x128xf32>
    %172 = vector.extract_strided_slice %0 {offsets = [4, 0], sizes = [1, 128], strides = [1, 1]} : vector<8x128xf32> to vector<1x128xf32>
    %173 = vector.broadcast %1 : vector<32x1xf32> to vector<32x128xf32>
    %174 = vector.broadcast %172 : vector<1x128xf32> to vector<32x128xf32>
    %175 = arith.mulf %173, %174 : vector<32x128xf32>
    %176 = vector.broadcast %2 : vector<32x1xf32> to vector<32x128xf32>
    %177 = arith.addf %175, %176 : vector<32x128xf32>
    %cst_51 = arith.constant 0.000000e+00 : f32
    %178 = vector.broadcast %cst_51 : f32 to vector<32x128xf32>
    %179 = arith.maximumf %177, %178 : vector<32x128xf32>
    %cst_52 = arith.constant dense<0.000000e+00> : vector<32x128xf32>
    %180 = tpu.matmul %3, %179, %cst_52 {dimension_numbers = #tpu.dot_dimension_numbers<[1], [0], [0], [1], [0, 0, 1, 1], [], []>} : vector<32x32xf32>, vector<32x128xf32>, vector<32x128xf32> -> vector<32x128xf32>
    %181 = vector.broadcast %4 : vector<32x1xf32> to vector<32x128xf32>
    %182 = arith.addf %180, %181 : vector<32x128xf32>
    %183 = vector.extract_strided_slice %5 {offsets = [0, 4], sizes = [32, 1], strides = [1, 1]} : vector<32x8xf32> to vector<32x1xf32>
    %184 = vector.broadcast %183 : vector<32x1xf32> to vector<32x128xf32>
    %185 = arith.addf %182, %184 : vector<32x128xf32>
    %cst_53 = arith.constant dense<0.000000e+00> : vector<128xf32>
    %186 = vector.multi_reduction <add>, %185, %cst_53 [0] : vector<32x128xf32> to vector<128xf32>
    %187 = vector.shape_cast %186 : vector<128xf32> to vector<1x128xf32>
    %cst_54 = arith.constant 3.200000e+01 : f32
    %188 = vector.broadcast %cst_54 : f32 to vector<1x128xf32>
    %189 = arith.divf %187, %188 : vector<1x128xf32>
    %190 = vector.broadcast %189 : vector<1x128xf32> to vector<32x128xf32>
    %191 = arith.subf %185, %190 : vector<32x128xf32>
    %192 = arith.mulf %191, %191 : vector<32x128xf32>
    %cst_55 = arith.constant dense<0.000000e+00> : vector<128xf32>
    %193 = vector.multi_reduction <add>, %192, %cst_55 [0] : vector<32x128xf32> to vector<128xf32>
    %194 = vector.shape_cast %193 : vector<128xf32> to vector<1x128xf32>
    %cst_56 = arith.constant 3.200000e+01 : f32
    %195 = vector.broadcast %cst_56 : f32 to vector<1x128xf32>
    %196 = arith.divf %194, %195 : vector<1x128xf32>
    %cst_57 = arith.constant 9.99999974E-6 : f32
    %197 = vector.broadcast %cst_57 : f32 to vector<1x128xf32>
    %198 = arith.addf %196, %197 : vector<1x128xf32>
    %199 = math.rsqrt %198 : vector<1x128xf32>
    %200 = vector.broadcast %199 : vector<1x128xf32> to vector<32x128xf32>
    %201 = arith.mulf %191, %200 : vector<32x128xf32>
    %202 = vector.broadcast %6 : vector<32x1xf32> to vector<32x128xf32>
    %203 = arith.mulf %201, %202 : vector<32x128xf32>
    %204 = vector.broadcast %7 : vector<32x1xf32> to vector<32x128xf32>
    %205 = arith.addf %203, %204 : vector<32x128xf32>
    %206 = vector.extract_strided_slice %8 {offsets = [0, 4], sizes = [32, 1], strides = [1, 1]} : vector<32x8xf32> to vector<32x1xf32>
    %207 = vector.broadcast %206 : vector<32x1xf32> to vector<32x128xf32>
    %208 = arith.mulf %205, %207 : vector<32x128xf32>
    %cst_58 = arith.constant dense<0.000000e+00> : vector<128xf32>
    %209 = vector.multi_reduction <add>, %208, %cst_58 [0] : vector<32x128xf32> to vector<128xf32>
    %210 = vector.shape_cast %209 : vector<128xf32> to vector<1x128xf32>
    %211 = arith.addf %171, %210 : vector<1x128xf32>
    %212 = vector.extract_strided_slice %0 {offsets = [5, 0], sizes = [1, 128], strides = [1, 1]} : vector<8x128xf32> to vector<1x128xf32>
    %213 = vector.broadcast %1 : vector<32x1xf32> to vector<32x128xf32>
    %214 = vector.broadcast %212 : vector<1x128xf32> to vector<32x128xf32>
    %215 = arith.mulf %213, %214 : vector<32x128xf32>
    %216 = vector.broadcast %2 : vector<32x1xf32> to vector<32x128xf32>
    %217 = arith.addf %215, %216 : vector<32x128xf32>
    %cst_59 = arith.constant 0.000000e+00 : f32
    %218 = vector.broadcast %cst_59 : f32 to vector<32x128xf32>
    %219 = arith.maximumf %217, %218 : vector<32x128xf32>
    %cst_60 = arith.constant dense<0.000000e+00> : vector<32x128xf32>
    %220 = tpu.matmul %3, %219, %cst_60 {dimension_numbers = #tpu.dot_dimension_numbers<[1], [0], [0], [1], [0, 0, 1, 1], [], []>} : vector<32x32xf32>, vector<32x128xf32>, vector<32x128xf32> -> vector<32x128xf32>
    %221 = vector.broadcast %4 : vector<32x1xf32> to vector<32x128xf32>
    %222 = arith.addf %220, %221 : vector<32x128xf32>
    %223 = vector.extract_strided_slice %5 {offsets = [0, 5], sizes = [32, 1], strides = [1, 1]} : vector<32x8xf32> to vector<32x1xf32>
    %224 = vector.broadcast %223 : vector<32x1xf32> to vector<32x128xf32>
    %225 = arith.addf %222, %224 : vector<32x128xf32>
    %cst_61 = arith.constant dense<0.000000e+00> : vector<128xf32>
    %226 = vector.multi_reduction <add>, %225, %cst_61 [0] : vector<32x128xf32> to vector<128xf32>
    %227 = vector.shape_cast %226 : vector<128xf32> to vector<1x128xf32>
    %cst_62 = arith.constant 3.200000e+01 : f32
    %228 = vector.broadcast %cst_62 : f32 to vector<1x128xf32>
    %229 = arith.divf %227, %228 : vector<1x128xf32>
    %230 = vector.broadcast %229 : vector<1x128xf32> to vector<32x128xf32>
    %231 = arith.subf %225, %230 : vector<32x128xf32>
    %232 = arith.mulf %231, %231 : vector<32x128xf32>
    %cst_63 = arith.constant dense<0.000000e+00> : vector<128xf32>
    %233 = vector.multi_reduction <add>, %232, %cst_63 [0] : vector<32x128xf32> to vector<128xf32>
    %234 = vector.shape_cast %233 : vector<128xf32> to vector<1x128xf32>
    %cst_64 = arith.constant 3.200000e+01 : f32
    %235 = vector.broadcast %cst_64 : f32 to vector<1x128xf32>
    %236 = arith.divf %234, %235 : vector<1x128xf32>
    %cst_65 = arith.constant 9.99999974E-6 : f32
    %237 = vector.broadcast %cst_65 : f32 to vector<1x128xf32>
    %238 = arith.addf %236, %237 : vector<1x128xf32>
    %239 = math.rsqrt %238 : vector<1x128xf32>
    %240 = vector.broadcast %239 : vector<1x128xf32> to vector<32x128xf32>
    %241 = arith.mulf %231, %240 : vector<32x128xf32>
    %242 = vector.broadcast %6 : vector<32x1xf32> to vector<32x128xf32>
    %243 = arith.mulf %241, %242 : vector<32x128xf32>
    %244 = vector.broadcast %7 : vector<32x1xf32> to vector<32x128xf32>
    %245 = arith.addf %243, %244 : vector<32x128xf32>
    %246 = vector.extract_strided_slice %8 {offsets = [0, 5], sizes = [32, 1], strides = [1, 1]} : vector<32x8xf32> to vector<32x1xf32>
    %247 = vector.broadcast %246 : vector<32x1xf32> to vector<32x128xf32>
    %248 = arith.mulf %245, %247 : vector<32x128xf32>
    %cst_66 = arith.constant dense<0.000000e+00> : vector<128xf32>
    %249 = vector.multi_reduction <add>, %248, %cst_66 [0] : vector<32x128xf32> to vector<128xf32>
    %250 = vector.shape_cast %249 : vector<128xf32> to vector<1x128xf32>
    %251 = arith.addf %211, %250 : vector<1x128xf32>
    %252 = vector.extract_strided_slice %0 {offsets = [6, 0], sizes = [1, 128], strides = [1, 1]} : vector<8x128xf32> to vector<1x128xf32>
    %253 = vector.broadcast %1 : vector<32x1xf32> to vector<32x128xf32>
    %254 = vector.broadcast %252 : vector<1x128xf32> to vector<32x128xf32>
    %255 = arith.mulf %253, %254 : vector<32x128xf32>
    %256 = vector.broadcast %2 : vector<32x1xf32> to vector<32x128xf32>
    %257 = arith.addf %255, %256 : vector<32x128xf32>
    %cst_67 = arith.constant 0.000000e+00 : f32
    %258 = vector.broadcast %cst_67 : f32 to vector<32x128xf32>
    %259 = arith.maximumf %257, %258 : vector<32x128xf32>
    %cst_68 = arith.constant dense<0.000000e+00> : vector<32x128xf32>
    %260 = tpu.matmul %3, %259, %cst_68 {dimension_numbers = #tpu.dot_dimension_numbers<[1], [0], [0], [1], [0, 0, 1, 1], [], []>} : vector<32x32xf32>, vector<32x128xf32>, vector<32x128xf32> -> vector<32x128xf32>
    %261 = vector.broadcast %4 : vector<32x1xf32> to vector<32x128xf32>
    %262 = arith.addf %260, %261 : vector<32x128xf32>
    %263 = vector.extract_strided_slice %5 {offsets = [0, 6], sizes = [32, 1], strides = [1, 1]} : vector<32x8xf32> to vector<32x1xf32>
    %264 = vector.broadcast %263 : vector<32x1xf32> to vector<32x128xf32>
    %265 = arith.addf %262, %264 : vector<32x128xf32>
    %cst_69 = arith.constant dense<0.000000e+00> : vector<128xf32>
    %266 = vector.multi_reduction <add>, %265, %cst_69 [0] : vector<32x128xf32> to vector<128xf32>
    %267 = vector.shape_cast %266 : vector<128xf32> to vector<1x128xf32>
    %cst_70 = arith.constant 3.200000e+01 : f32
    %268 = vector.broadcast %cst_70 : f32 to vector<1x128xf32>
    %269 = arith.divf %267, %268 : vector<1x128xf32>
    %270 = vector.broadcast %269 : vector<1x128xf32> to vector<32x128xf32>
    %271 = arith.subf %265, %270 : vector<32x128xf32>
    %272 = arith.mulf %271, %271 : vector<32x128xf32>
    %cst_71 = arith.constant dense<0.000000e+00> : vector<128xf32>
    %273 = vector.multi_reduction <add>, %272, %cst_71 [0] : vector<32x128xf32> to vector<128xf32>
    %274 = vector.shape_cast %273 : vector<128xf32> to vector<1x128xf32>
    %cst_72 = arith.constant 3.200000e+01 : f32
    %275 = vector.broadcast %cst_72 : f32 to vector<1x128xf32>
    %276 = arith.divf %274, %275 : vector<1x128xf32>
    %cst_73 = arith.constant 9.99999974E-6 : f32
    %277 = vector.broadcast %cst_73 : f32 to vector<1x128xf32>
    %278 = arith.addf %276, %277 : vector<1x128xf32>
    %279 = math.rsqrt %278 : vector<1x128xf32>
    %280 = vector.broadcast %279 : vector<1x128xf32> to vector<32x128xf32>
    %281 = arith.mulf %271, %280 : vector<32x128xf32>
    %282 = vector.broadcast %6 : vector<32x1xf32> to vector<32x128xf32>
    %283 = arith.mulf %281, %282 : vector<32x128xf32>
    %284 = vector.broadcast %7 : vector<32x1xf32> to vector<32x128xf32>
    %285 = arith.addf %283, %284 : vector<32x128xf32>
    %286 = vector.extract_strided_slice %8 {offsets = [0, 6], sizes = [32, 1], strides = [1, 1]} : vector<32x8xf32> to vector<32x1xf32>
    %287 = vector.broadcast %286 : vector<32x1xf32> to vector<32x128xf32>
    %288 = arith.mulf %285, %287 : vector<32x128xf32>
    %cst_74 = arith.constant dense<0.000000e+00> : vector<128xf32>
    %289 = vector.multi_reduction <add>, %288, %cst_74 [0] : vector<32x128xf32> to vector<128xf32>
    %290 = vector.shape_cast %289 : vector<128xf32> to vector<1x128xf32>
    %291 = arith.addf %251, %290 : vector<1x128xf32>
    %292 = vector.extract_strided_slice %0 {offsets = [7, 0], sizes = [1, 128], strides = [1, 1]} : vector<8x128xf32> to vector<1x128xf32>
    %293 = vector.broadcast %1 : vector<32x1xf32> to vector<32x128xf32>
    %294 = vector.broadcast %292 : vector<1x128xf32> to vector<32x128xf32>
    %295 = arith.mulf %293, %294 : vector<32x128xf32>
    %296 = vector.broadcast %2 : vector<32x1xf32> to vector<32x128xf32>
    %297 = arith.addf %295, %296 : vector<32x128xf32>
    %cst_75 = arith.constant 0.000000e+00 : f32
    %298 = vector.broadcast %cst_75 : f32 to vector<32x128xf32>
    %299 = arith.maximumf %297, %298 : vector<32x128xf32>
    %cst_76 = arith.constant dense<0.000000e+00> : vector<32x128xf32>
    %300 = tpu.matmul %3, %299, %cst_76 {dimension_numbers = #tpu.dot_dimension_numbers<[1], [0], [0], [1], [0, 0, 1, 1], [], []>} : vector<32x32xf32>, vector<32x128xf32>, vector<32x128xf32> -> vector<32x128xf32>
    %301 = vector.broadcast %4 : vector<32x1xf32> to vector<32x128xf32>
    %302 = arith.addf %300, %301 : vector<32x128xf32>
    %303 = vector.extract_strided_slice %5 {offsets = [0, 7], sizes = [32, 1], strides = [1, 1]} : vector<32x8xf32> to vector<32x1xf32>
    %304 = vector.broadcast %303 : vector<32x1xf32> to vector<32x128xf32>
    %305 = arith.addf %302, %304 : vector<32x128xf32>
    %cst_77 = arith.constant dense<0.000000e+00> : vector<128xf32>
    %306 = vector.multi_reduction <add>, %305, %cst_77 [0] : vector<32x128xf32> to vector<128xf32>
    %307 = vector.shape_cast %306 : vector<128xf32> to vector<1x128xf32>
    %cst_78 = arith.constant 3.200000e+01 : f32
    %308 = vector.broadcast %cst_78 : f32 to vector<1x128xf32>
    %309 = arith.divf %307, %308 : vector<1x128xf32>
    %310 = vector.broadcast %309 : vector<1x128xf32> to vector<32x128xf32>
    %311 = arith.subf %305, %310 : vector<32x128xf32>
    %312 = arith.mulf %311, %311 : vector<32x128xf32>
    %cst_79 = arith.constant dense<0.000000e+00> : vector<128xf32>
    %313 = vector.multi_reduction <add>, %312, %cst_79 [0] : vector<32x128xf32> to vector<128xf32>
    %314 = vector.shape_cast %313 : vector<128xf32> to vector<1x128xf32>
    %cst_80 = arith.constant 3.200000e+01 : f32
    %315 = vector.broadcast %cst_80 : f32 to vector<1x128xf32>
    %316 = arith.divf %314, %315 : vector<1x128xf32>
    %cst_81 = arith.constant 9.99999974E-6 : f32
    %317 = vector.broadcast %cst_81 : f32 to vector<1x128xf32>
    %318 = arith.addf %316, %317 : vector<1x128xf32>
    %319 = math.rsqrt %318 : vector<1x128xf32>
    %320 = vector.broadcast %319 : vector<1x128xf32> to vector<32x128xf32>
    %321 = arith.mulf %311, %320 : vector<32x128xf32>
    %322 = vector.broadcast %6 : vector<32x1xf32> to vector<32x128xf32>
    %323 = arith.mulf %321, %322 : vector<32x128xf32>
    %324 = vector.broadcast %7 : vector<32x1xf32> to vector<32x128xf32>
    %325 = arith.addf %323, %324 : vector<32x128xf32>
    %326 = vector.extract_strided_slice %8 {offsets = [0, 7], sizes = [32, 1], strides = [1, 1]} : vector<32x8xf32> to vector<32x1xf32>
    %327 = vector.broadcast %326 : vector<32x1xf32> to vector<32x128xf32>
    %328 = arith.mulf %325, %327 : vector<32x128xf32>
    %cst_82 = arith.constant dense<0.000000e+00> : vector<128xf32>
    %329 = vector.multi_reduction <add>, %328, %cst_82 [0] : vector<32x128xf32> to vector<128xf32>
    %330 = vector.shape_cast %329 : vector<128xf32> to vector<1x128xf32>
    %331 = arith.addf %291, %330 : vector<1x128xf32>
    %332 = vector.broadcast %10 : f32 to vector<1x128xf32>
    %333 = arith.addf %331, %332 : vector<1x128xf32>
    %c0_83 = arith.constant 0 : index
    %c0_84 = arith.constant 0 : index
    %334 = vector.load %arg11[%c0_83, %c0_84] : memref<1x128xf32, #tpu.memory_space<vmem>>, vector<1x128xf32>
    tpu.vector_store %arg11[%c0_83, %c0_84], %333 {strides = array<i32>} : memref<1x128xf32, #tpu.memory_space<vmem>>, vector<1x128xf32>,
    return
  }
  func.func @transform_0(%arg0: i32) -> (i32, i32) {
    %c0_i32 = arith.constant 0 : i32
    %c0_i32_0 = arith.constant 0 : i32
    return %c0_i32, %arg0 : i32, i32
  }
  func.func @transform_1(%arg0: i32) -> (i32, i32) {
    %c0_i32 = arith.constant 0 : i32
    %c0_i32_0 = arith.constant 0 : i32
    %c0_i32_1 = arith.constant 0 : i32
    return %c0_i32, %c0_i32_0 : i32, i32
  }
  func.func @transform_2(%arg0: i32) -> (i32, i32) {
    %c0_i32 = arith.constant 0 : i32
    %c0_i32_0 = arith.constant 0 : i32
    %c0_i32_1 = arith.constant 0 : i32
    return %c0_i32, %c0_i32_0 : i32, i32
  }
  func.func @transform_3(%arg0: i32) -> (i32, i32) {
    %c0_i32 = arith.constant 0 : i32
    %c0_i32_0 = arith.constant 0 : i32
    %c0_i32_1 = arith.constant 0 : i32
    return %c0_i32, %c0_i32_0 : i32, i32
  }
  func.func @transform_4(%arg0: i32) -> (i32, i32) {
    %c0_i32 = arith.constant 0 : i32
    %c0_i32_0 = arith.constant 0 : i32
    %c0_i32_1 = arith.constant 0 : i32
    return %c0_i32, %c0_i32_0 : i32, i32
  }
  func.func @transform_5(%arg0: i32) -> (i32, i32) {
    %c0_i32 = arith.constant 0 : i32
    %c0_i32_0 = arith.constant 0 : i32
    %c0_i32_1 = arith.constant 0 : i32
    return %c0_i32, %c0_i32_0 : i32, i32
  }
  func.func @transform_6(%arg0: i32) -> (i32, i32) {
    %c0_i32 = arith.constant 0 : i32
    %c0_i32_0 = arith.constant 0 : i32
    %c0_i32_1 = arith.constant 0 : i32
    return %c0_i32, %c0_i32_0 : i32, i32
  }
  func.func @transform_7(%arg0: i32) -> (i32, i32) {
    %c0_i32 = arith.constant 0 : i32
    %c0_i32_0 = arith.constant 0 : i32
    %c0_i32_1 = arith.constant 0 : i32
    return %c0_i32, %c0_i32_0 : i32, i32
  }
  func.func @transform_8(%arg0: i32) -> (i32, i32) {
    %c0_i32 = arith.constant 0 : i32
    %c0_i32_0 = arith.constant 0 : i32
    %c0_i32_1 = arith.constant 0 : i32
    return %c0_i32, %c0_i32_0 : i32, i32
  }
  func.func @transform_9(%arg0: i32) -> (i32, i32) {
    %c0_i32 = arith.constant 0 : i32
    %c0_i32_0 = arith.constant 0 : i32
    %c0_i32_1 = arith.constant 0 : i32
    return %c0_i32, %c0_i32_0 : i32, i32
  }
  func.func @transform_10(%arg0: i32) -> (i32, i32) {
    %c0_i32 = arith.constant 0 : i32
    %c0_i32_0 = arith.constant 0 : i32
    return %c0_i32, %arg0 : i32, i32
  }
}

</mosaic_0001>

<bundles_post_ra>
// kernel: tpu_custom_call.1
= control target key start
LH: loop header
LB: loop body
LE: loop exit
PB: predicated region body
PF: predicated region fallthrough
CT: control target
= control target key end

     0   :  { %s3564_s0 = inlined_call_operand.vmem [shape: f32[8,384], index: 0, kind: input, shape index: {}]   ;;  %s3565_s1 = inlined_call_operand.vmem [shape: f32[32,1], index: 1, kind: input, shape index: {}]   ;;  %s3566_s2 = inlined_call_operand.vmem [shape: f32[32,1], index: 2, kind: input, shape index: {}]   ;;  %s3567_s3 = inlined_call_operand.vmem [shape: f32[32,32], index: 3, kind: input, shape index: {}]   ;;  %s3568_s4 = inlined_call_operand.vmem [shape: f32[32,1], index: 4, kind: input, shape index: {}]   ;;  %s3569_s5 = inlined_call_operand.vmem [shape: f32[32,8], index: 5, kind: input, shape index: {}]   ;;  %s3570_s6 = inlined_call_operand.vmem [shape: f32[32,1], index: 6, kind: input, shape index: {}]   ;;  %s3571_s7 = inlined_call_operand.vmem [shape: f32[32,1], index: 7, kind: input, shape index: {}]   ;;  %s3572_s8 = inlined_call_operand.vmem [shape: f32[32,8], index: 8, kind: input, shape index: {}]   ;;  %s3573_s9 = inlined_call_operand.<no memory space> [shape: f32[1,1], index: 9, kind: input, shape index: {}]   ;;  %s3574_s10 = inlined_call_operand.hbm [shape: f32[1,384], index: 10, kind: output, shape index: {}]  }
   0x1   :  { %v15_v0 = vstv %s3573_s9 }
   0x2   :  { %16 = vst [vmem:[#allocation2] sm:$0x1] %v15_v0 }
   0x3   :  { %17 = vsyncpa [#allocation4], 0 }
   0x4   :  { %19 = vsyncpa [#allocation4 + $0x1], 0  ;;  %s2579_s15 = smov 0   ;;  %s2581_s16 = smov 0  }
   0x5   :  { %s2583_s17 = smov 0   ;;  %s2585_s18 = smov 0  }
   0x6 LB: > { %s2600_s9 = sadd.s32 4294967295, %s2510_s18   ;;  %s2128_s19 = sadd.s32 4294967294, %s2510_s18   ;;  %s2510_s18 = sphi %s2585_s18, %s3621_s18   ;;  %s2506_s17 = sphi %s2583_s17, %s3620_s17   ;;  %s2502_s16 = sphi %s2581_s16, %s3619_s16   ;;  %s2498_s15 = sphi %s2579_s15, %s3618_s15  }
   0x7   : > { %s2604_s20 = sadd.s32 1, %s2510_s18   ;;  %s247_s21 = sadd.s32 1, %s2506_s17 }
   0x8   : > { %s244_s22 = ssub.s32 %s2510_s18, %s2604_s20  ;;  %p257_p0 = scmp.ne.s32.totalorder %s2506_s17, %s2502_s16 }
   0x9   : > { %p245_p1 = scmp.eq.s32.totalorder %s244_s22, 0  ;;  %p258_p2 = scmp.eq.s32.totalorder %s2600_s9, 2 }
   0xa   : > { %p263_p3 = scmp.ne.s32.totalorder %s2502_s16, %s2498_s15  ;;  %p264_p4 = scmp.eq.s32.totalorder %s2128_s19, 2 }
   0xb   : > { %s2615_s23 = scalar_select %p245_p1, %s2506_s17, %s247_s21  }
   0xc   : > { %p2617_p5 = por %p258_p2, %p257_p0  ;;  %p2621_p6 = por %p264_p4, %p263_p3 }
   0xd   : > { %p2131_p7 = scmp.ge.s32.totalorder %s2510_s18, 1  ;;  %p316_p8 = scmp.lt.s32.totalorder %s2510_s18, 4 }
   0xf   : > { %p317_p9 = pnand %p2131_p7, %p316_p8 }
  0x11   : > { %320 = sbr.rel (%p317_p9) target bundleno = 535 (0x217), region = 60 }
  0x16   : > { %v364_v1 = vld [vmem:[%s3566_s2 + $0x18] sm:$0xff]  ;;  %v2512_v3 = vmov 0   ;;  %v359_v4 = vld [vmem:[%s3565_s1 + $0x10] sm:$0xff]  ;;  %v358_v5 = vld [vmem:[%s3565_s1 + $0x8] sm:$0xff]  ;;  %vm467_vm0 = vcmask 261120   ;;  %v2513_v31 = vmov 1   ;;  %v411_v37 = vlaneseq }
  0x17   : > { %v360_v2 = vld [vmem:[%s3565_s1 + $0x18] sm:$0xff]  ;;  %2394 = vset.pattern.permute.xlu1 %v2512_v3  ;;  %2393 = vset.pattern.permute.xlu0 %v2512_v3  ;;  %v363_v6 = vld [vmem:[%s3566_s2 + $0x10] sm:$0xff]  ;;  %v357_v7 = vld [vmem:[%s3565_s1] sm:$0xff]  ;;  %v2514_v32 = vmov 2   ;;  %v2515_v33 = vmov 3   ;;  %v2516_v34 = vmov 4  }
  0x18   : > { %436 = vperm.xlu1 %2394, %v364_v1   ;;  %408 = vperm.xlu0 %2393, %v360_v2   ;;  %v362_v8 = vld [vmem:[%s3566_s2 + $0x8] sm:$0xff]  ;;  %v361_v9 = vld [vmem:[%s3566_s2] sm:$0xff]  ;;  %v371_v13 = vld [vmem:[%s3568_s4 + $0x10] sm:$0xff]  ;;  %v2517_v35 = vmov 5   ;;  %p352_p10 = scmp.lt.s32.totalorder %s2600_s9, 2  ;;  %v2518_v36 = vmov 6  }
  0x19   : > { %v369_v10 = vld [vmem:[%s3568_s4] sm:$0xff]  ;;  %v370_v11 = vld [vmem:[%s3568_s4 + $0x8] sm:$0xff]  ;;  %v372_v14 = vld [vmem:[%s3568_s4 + $0x18] sm:$0xff]  ;;  %v2519_v38 = vmov 7   ;;  %v2783_v39 = vshrl.u32 %v411_v37, 7  ;;  %s350_s19 = sand.u32 1, %s2502_s16  }
  0x1a   : > { %v2660_v12 = vld [vmem:[%s3567_s3] sm:$0xff]  ;;  %v2680_v16 = vld [vmem:[%s3569_s5 + $0x8] sm:$0xff]  ;;  %v2687_v17 = vld [vmem:[%s3569_s5 + $0x10] sm:$0xff]  ;;  %s353_s21 = scalar_select %p352_p10, %s2600_s9, 2 }
  0x1b   : > { %2240 = vmatprep.mubr.msk.f32.mxu0 %vm467_vm0, %v2660_v12  ;;  %2254 = vmatprep.mubr.msk.f32.mxu1 %vm467_vm0, %v2660_v12  ;;  %v2675_v15 = vld [vmem:[%s3569_s5] sm:$0xff]  ;;  %v2692_v18 = vld [vmem:[%s3569_s5 + $0x18] sm:$0xff]  ;;  %v378_v20 = vld [vmem:[%s3570_s6 + $0x8] sm:$0xff]  ;;  %v413_v40 = vsub.s32 0, %v2783_v39  ;;  %v708_v41 = vsub.s32 1, %v2783_v39  ;;  %v901_v49 = vsub.s32 2, %v2783_v39 }
  0x1c   : > { %403 = vperm.xlu0 %2393, %v359_v4   ;;  %398 = vperm.xlu1 %2394, %v358_v5   ;;  %v377_v19 = vld [vmem:[%s3570_s6] sm:$0xff]  ;;  %v379_v21 = vld [vmem:[%s3570_s6 + $0x10] sm:$0xff]  ;;  %v380_v22 = vld [vmem:[%s3570_s6 + $0x18] sm:$0xff]  ;;  %s2132_s22 = sshll.u32 %s353_s21, 3  ;;  %v1094_v54 = vsub.s32 3, %v2783_v39  ;;  %s351_s26 = scalar_lea.vmem [#allocation3], %s350_s19 }
  0x1d   : > { %v381_v23 = vld [vmem:[%s3571_s7] sm:$0xff]  ;;  %v382_v24 = vld [vmem:[%s3571_s7 + $0x8] sm:$0xff]  ;;  %v383_v25 = vld [vmem:[%s3571_s7 + $0x10] sm:$0xff]  ;;  %s355_s28 = scalar_lea.vmem %s3564_s0, %s2132_s22  ;;  %s2165_s22 = sshll.u32 %s2600_s9, 4 }
  0x1e   : > { %v384_v26 = vld [vmem:[%s3571_s7 + $0x18] sm:$0xff]  ;;  %v2723_v27 = vld [vmem:[%s3572_s8] sm:$0xff]  ;;  %v2728_v28 = vld [vmem:[%s3572_s8 + $0x8] sm:$0xff]  ;;  %s2073_s27 = sshll.u32 %s351_s26, 4  ;;  %s2071_s30 = scalar_lea.hbm %s3574_s10, %s2165_s22  ;;  %s2074_s27 = int_to_ptr.vmem [resolvable:$true] %s2073_s27 }
  0x1f   : > { %v2735_v29 = vld [vmem:[%s3572_s8 + $0x10] sm:$0xff]  ;;  %v2740_v30 = vld [vmem:[%s3572_s8 + $0x18] sm:$0xff]  ;;  %v2793_v42 = vld [vmem:[%s355_s28] sm:$0xff]  ;;  %s2061_s11 = scalar_lea.sflag [#allocation4], %s350_s19  ;;  %s2450_s12 = scalar_lea.vmem %s2074_s27, 16 }
  0x20   : > { %431 = vperm.xlu0 %2393, %v363_v6   ;;  %393 = vperm.xlu1 %2394, %v357_v7   ;;  %v414_v43 = vrot.slane %v2793_v42, %v413_v40  ;;  %v709_v44 = vrot.slane %v2793_v42, %v708_v41  ;;  %v2819_v57 = vrot.slane %v2793_v42, %v901_v49  ;;  %v2863_v40 = vld [vmem:[%s3567_s3 + $0x8] sm:$0xff]  ;;  %p2451_p11 = scmp.ne.s32.totalorder %s2074_s27, %s2450_s12  ;;  %s2520_s13 = smov [#allocation3]  }
  0x21   : > { %v1095_v62 = vrot.slane %v2793_v42, %v1094_v54  ;;  %s2454_s14 = sshll.u32 %s2520_s13, 4  ;;  %s2455_s14 = int_to_ptr.vmem [resolvable:$false] %s2454_s14 }
  0x22   : > { %p2452_p12 = pnand %p2451_p11, %p2617_p5  ;;  %s2456_s9 = scalar_lea.vmem %s2455_s14, 32 }
  0x23   : > { %p2457_p0 = scmp.lt.s32.totalorder %s2074_s27, %s2455_s14  ;;  %p2458_p1 = scmp.lt.s32.totalorder %s2456_s9, %s2450_s12 }
  0x24   : > { %426 = vperm.xlu0 %2393, %v362_v8   ;;  %421 = vperm.xlu1 %2394, %v361_v9   ;;  %p2453_p13 = pneg %p2452_p12 }
  0x25   : > { %p2459_p2 = por %p2458_p1, %p2457_p0 }
  0x27   : > { %p2460_p3 = pnand %p2459_p2, %p2453_p13 }
  0x28   : > { %449 = vperm.xlu0 %2393, %v369_v10   ;;  %454 = vperm.xlu1 %2394, %v370_v11  }
  0x2c   : > { %459 = vperm.xlu0 %2393, %v371_v13   ;;  %464 = vperm.xlu1 %2394, %v372_v14  }
  0x30   : > { %567 = vperm.xlu0 %2393, %v2675_v15   ;;  %572 = vperm.xlu1 %2394, %v2680_v16  }
  0x34   : > { %577 = vperm.xlu0 %2393, %v2687_v17   ;;  %582 = vperm.xlu1 %2394, %v2692_v18  }
  0x38   : > { %626 = vperm.xlu0 %2393, %v377_v19   ;;  %631 = vperm.xlu1 %2394, %v378_v20   ;;  %v1287_v19 = vsub.s32 4, %v2783_v39 }
  0x3c   : > { %636 = vperm.xlu0 %2393, %v379_v21   ;;  %641 = vperm.xlu1 %2394, %v380_v22  }
  0x40   : > { %650 = vperm.xlu0 %2393, %v381_v23   ;;  %655 = vperm.xlu1 %2394, %v382_v24   ;;  %v1480_v23 = vsub.s32 5, %v2783_v39 }
  0x44   : > { %660 = vperm.xlu0 %2393, %v383_v25   ;;  %665 = vperm.xlu1 %2394, %v384_v26  }
  0x48   : > { %674 = vperm.xlu0 %2393, %v2723_v27   ;;  %679 = vperm.xlu1 %2394, %v2728_v28  }
  0x4c   : > { %684 = vperm.xlu0 %2393, %v2735_v29   ;;  %689 = vperm.xlu1 %2394, %v2740_v30  }
  0x50   : > { %2396 = vset.pattern.permute.xlu1 %v2513_v31  ;;  %2395 = vset.pattern.permute.xlu0 %v2513_v31 }
  0x51   : > { %812 = vperm.xlu1 %2396, %v2680_v16   ;;  %808 = vperm.xlu0 %2395, %v2675_v15  }
  0x55   : > { %816 = vperm.xlu1 %2396, %v2687_v17   ;;  %820 = vperm.xlu0 %2395, %v2692_v18  }
  0x59   : > { %870 = vperm.xlu1 %2396, %v2723_v27   ;;  %874 = vperm.xlu0 %2395, %v2728_v28  }
  0x5d   : > { %878 = vperm.xlu1 %2396, %v2735_v29   ;;  %882 = vperm.xlu0 %2395, %v2740_v30  }
  0x61   : > { %2397 = vset.pattern.permute.xlu1 %v2514_v32  ;;  %2398 = vset.pattern.permute.xlu0 %v2514_v32 }
  0x62   : > { %1001 = vperm.xlu1 %2397, %v2675_v15   ;;  %1005 = vperm.xlu0 %2398, %v2680_v16  }
  0x66   : > { %1009 = vperm.xlu1 %2397, %v2687_v17   ;;  %1063 = vperm.xlu0 %2398, %v2723_v27  }
  0x6a   : > { %1013 = vperm.xlu1 %2397, %v2692_v18   ;;  %1071 = vperm.xlu0 %2398, %v2735_v29  }
  0x6e   : > { %1067 = vperm.xlu1 %2397, %v2728_v28   ;;  %2400 = vset.pattern.permute.xlu0 %v2515_v33 }
  0x6f   : > { %1198 = vperm.xlu0 %2400, %v2680_v16  }
  0x72   : > { %2399 = vset.pattern.permute.xlu1 %v2515_v33 }
  0x73   : > { %1194 = vperm.xlu1 %2399, %v2675_v15   ;;  %2402 = vset.pattern.permute.xlu0 %v2516_v34 }
  0x74   : > { %1391 = vperm.xlu0 %2402, %v2680_v16  }
  0x77   : > { %1202 = vperm.xlu1 %2399, %v2687_v17  }
  0x78   : > { %2405 = vset.pattern.permute.xlu0 %v2517_v35 }
  0x79   : > { %1580 = vperm.xlu0 %2405, %v2675_v15  }
  0x7b   : > { %2401 = vset.pattern.permute.xlu1 %v2516_v34 }
  0x7c   : > { %1387 = vperm.xlu1 %2401, %v2675_v15  }
  0x7d   : > { %1588 = vperm.xlu0 %2405, %v2687_v17  }
  0x80   : > { %2403 = vset.pattern.permute.xlu1 %v2515_v33 }
  0x81   : > { %1206 = vperm.xlu1 %2403, %v2692_v18   ;;  %2409 = vset.pattern.permute.xlu0 %v2518_v36 }
  0x82   : > { %1777 = vperm.xlu0 %2409, %v2680_v16  }
  0x85   : > { %2404 = vset.pattern.permute.xlu1 %v2516_v34 }
  0x86   : > { %1395 = vperm.xlu1 %2404, %v2687_v17   ;;  %2412 = vset.pattern.permute.xlu0 %v2519_v38 }
  0x87   : > { %1966 = vperm.xlu0 %2412, %v2675_v15  }
  0x8a   : > { %2406 = vset.pattern.permute.xlu1 %v2517_v35 }
  0x8b   : > { %1584 = vperm.xlu1 %2406, %v2680_v16   ;;  %1974 = vperm.xlu0 %2412, %v2687_v17  }
  0x8f   : > { %2407 = vset.pattern.permute.xlu1 %v2516_v34  ;;  %2416 = vset.pattern.permute.xlu0 %v2515_v33 }
  0x90   : > { %1399 = vperm.xlu1 %2407, %v2692_v18   ;;  %1256 = vperm.xlu0 %2416, %v2723_v27  }
  0x93   : > { %v2801_v45 = vpop.permute.xlu1 %436  ;;  %v2803_v46 = vpop.permute.xlu0 %408 }
  0x94   : > { %v418_v47 = vmul.f32 %v414_v43, %v2803_v46  ;;  %v713_v48 = vmul.f32 %v709_v44, %v2803_v46  ;;  %2408 = vset.pattern.permute.xlu1 %v2518_v36  ;;  %1264 = vperm.xlu0 %2416, %v2735_v29   ;;  %v906_v2 = vmul.f32 %v2819_v57, %v2803_v46 }
  0x95   : > { %1773 = vperm.xlu1 %2408, %v2675_v15   ;;  %v1099_v10 = vmul.f32 %v1095_v62, %v2803_v46 }
  0x96   : > { %v442_v50 = vadd.f32 %v2801_v45, %v418_v47  ;;  %v717_v51 = vadd.f32 %v713_v48, %v2801_v45  ;;  %v910_v22 = vadd.f32 %v906_v2, %v2801_v45 }
  0x97   : > { %v2813_v52 = vpop.permute.xlu0 %403  ;;  %v2815_v53 = vpop.permute.xlu1 %398  ;;  %v1103_v24 = vadd.f32 %v1099_v10, %v2801_v45  ;;  %v1866_v10 = vsub.s32 7, %v2783_v39 }
  0x98   : > { %v446_v55 = vmax.f32 %v442_v50, 0.0  ;;  %v721_v56 = vmax.f32 %v717_v51, 0.0  ;;  %v417_v58 = vmul.f32 %v414_v43, %v2813_v52  ;;  %v712_v59 = vmul.f32 %v709_v44, %v2813_v52  ;;  %2420 = vset.pattern.permute.xlu0 %v2516_v34 }
  0x99   : > { %2410 = vset.pattern.permute.xlu1 %v2517_v35  ;;  %v416_v1 = vmul.f32 %v414_v43, %v2815_v53  ;;  %v711_v5 = vmul.f32 %v709_v44, %v2815_v53  ;;  %1453 = vperm.xlu0 %2420, %v2728_v28   ;;  %v905_v25 = vmul.f32 %v2819_v57, %v2813_v52  ;;  %v914_v47 = vmax.f32 %v910_v22, 0.0 }
  0x9a   : > { %2232 = vmatprep.subr.mxu0 %v446_v55  ;;  %2246 = vmatprep.subr.mxu1 %v721_v56  ;;  %v1098_v26 = vmul.f32 %v1095_v62, %v2813_v52  ;;  %v1107_v48 = vmax.f32 %v1103_v24, 0.0  ;;  %v904_v49 = vmul.f32 %v2819_v57, %v2815_v53  ;;  %v1097_v50 = vmul.f32 %v1095_v62, %v2815_v53 }
  0x9b   : > { %v2824_v60 = vpop.permute.xlu0 %431  ;;  %v2826_v61 = vpop.permute.xlu1 %393  ;;  %2233 = vmatpush3.msra.mxu0 %v446_v55  ;;  %2247 = vmatpush3.msra.mxu1 %v721_v56  ;;  %v2925_v22 = vrot.slane %v2793_v42, %v1866_v10 }
  0x9c   : > { %v441_v63 = vadd.f32 %v2824_v60, %v417_v58  ;;  %v716_v0 = vadd.f32 %v712_v59, %v2824_v60  ;;  %1592 = vperm.xlu1 %2410, %v2692_v18   ;;  %v415_v6 = vmul.f32 %v414_v43, %v2826_v61  ;;  %v710_v9 = vmul.f32 %v709_v44, %v2826_v61  ;;  %v2886_v58 = vld [vmem:[%s3567_s3 + $0x10] sm:$0xff] }
  0x9d   : > { %2423 = vset.pattern.permute.xlu0 %v2517_v35  ;;  %v909_v41 = vadd.f32 %v905_v25, %v2824_v60  ;;  %v1102_v43 = vadd.f32 %v1098_v26, %v2824_v60  ;;  %v2871_v44 = vrot.slane %v2793_v42, %v1480_v23  ;;  %v903_v51 = vmul.f32 %v2819_v57, %v2826_v61 }
  0x9e   : > { %v445_v3 = vmax.f32 %v441_v63, 0.0  ;;  %v720_v4 = vmax.f32 %v716_v0, 0.0  ;;  %1642 = vperm.xlu0 %2423, %v2723_v27   ;;  %v1096_v54 = vmul.f32 %v1095_v62, %v2826_v61  ;;  %v2895_v62 = vld [vmem:[%s3567_s3 + $0x18] sm:$0xff] }
  0x9f   : > { %v2839_v7 = vpop.permute.xlu0 %426  ;;  %v2841_v8 = vpop.permute.xlu1 %421  ;;  %v913_v55 = vmax.f32 %v909_v41, 0.0  ;;  %v1106_v56 = vmax.f32 %v1102_v43, 0.0  ;;  %v1485_v2 = vmul.f32 %v2871_v44, %v2803_v46  ;;  %v1483_v25 = vmul.f32 %v2871_v44, %v2815_v53 }
  0xa0   : > { %2234 = vmatprep.subr.mxu0 %v445_v3  ;;  %2248 = vmatprep.subr.mxu1 %v720_v4  ;;  %v440_v11 = vadd.f32 %v2839_v7, %v416_v1  ;;  %v715_v13 = vadd.f32 %v711_v5, %v2839_v7  ;;  %v439_v14 = vadd.f32 %v2841_v8, %v415_v6 }
  0xa1   : > { %2235 = vmatpush3.msra.mxu0 %v445_v3  ;;  %2249 = vmatpush3.msra.mxu1 %v720_v4  ;;  %v714_v15 = vadd.f32 %v710_v9, %v2841_v8  ;;  %v908_v59 = vadd.f32 %v904_v49, %v2839_v7  ;;  %v1101_v63 = vadd.f32 %v1097_v50, %v2839_v7  ;;  %v1673_v9 = vsub.s32 6, %v2783_v39 }
  0xa2   : > { %v444_v20 = vmax.f32 %v440_v11, 0.0  ;;  %v719_v21 = vmax.f32 %v715_v13, 0.0  ;;  %2411 = vset.pattern.permute.xlu1 %v2518_v36  ;;  %v443_v31 = vmax.f32 %v439_v14, 0.0  ;;  %v907_v0 = vadd.f32 %v903_v51, %v2841_v8  ;;  %1650 = vperm.xlu0 %2423, %v2735_v29  }
  0xa3   : > { %1781 = vperm.xlu1 %2411, %v2687_v17   ;;  %v718_v37 = vmax.f32 %v714_v15, 0.0  ;;  %v2868_v17 = vrot.slane %v2793_v42, %v1287_v19  ;;  %v1100_v1 = vadd.f32 %v1096_v54, %v2841_v8  ;;  %v912_v3 = vmax.f32 %v908_v59, 0.0 }
  0xa4   : > { %2236 = vmatprep.subr.mxu0 %v444_v20  ;;  %2250 = vmatprep.subr.mxu1 %v719_v21  ;;  %v1105_v4 = vmax.f32 %v1101_v63, 0.0  ;;  %v911_v11 = vmax.f32 %v907_v0, 0.0  ;;  %v1489_v14 = vadd.f32 %v1485_v2, %v2801_v45  ;;  %v1484_v15 = vmul.f32 %v2871_v44, %v2813_v52 }
  0xa5   : > { %2237 = vmatpush3.msra.mxu0 %v444_v20  ;;  %2251 = vmatpush3.msra.mxu1 %v719_v21  ;;  %v1292_v57 = vmul.f32 %v2868_v17, %v2803_v46  ;;  %v1291_v6 = vmul.f32 %v2868_v17, %v2813_v52  ;;  %v1104_v13 = vmax.f32 %v1100_v1, 0.0  ;;  %v1290_v39 = vmul.f32 %v2868_v17, %v2815_v53 }
  0xa6   : > { %2238 = vmatprep.subr.mxu0 %v443_v31  ;;  %2252 = vmatprep.subr.mxu1 %v718_v37  ;;  %v1488_v20 = vadd.f32 %v1484_v15, %v2824_v60  ;;  %v1674_v21 = vrot.slane %v2793_v42, %v1673_v9  ;;  %v1493_v24 = vmax.f32 %v1489_v14, 0.0  ;;  %v1289_v41 = vmul.f32 %v2868_v17, %v2826_v61 }
  0xa7   : > { %2239 = vmatpush3.msra.mxu0 %v443_v31  ;;  %2253 = vmatpush3.msra.mxu1 %v718_v37  ;;  %v1296_v5 = vadd.f32 %v1292_v57, %v2801_v45  ;;  %v1295_v19 = vadd.f32 %v1291_v6, %v2824_v60  ;;  %v1294_v31 = vadd.f32 %v1290_v39, %v2839_v7 }
  0xa8   : > { %2241 = vmatmul.mubr.msk.f32.vlgmr.msra.gmra.mxu0 %vm467_vm0, %v2863_v40  ;;  %2255 = vmatmul.mubr.msk.f32.vlgmr.msra.gmra.mxu1 %vm467_vm0, %v2863_v40  ;;  %v1492_v42 = vmax.f32 %v1488_v20, 0.0  ;;  %v1487_v37 = vadd.f32 %v1483_v25, %v2839_v7  ;;  %v1482_v43 = vmul.f32 %v2871_v44, %v2826_v61  ;;  %v1293_v49 = vadd.f32 %v1289_v41, %v2841_v8 }
  0xa9   : > { %2260 = vmatprep.subr.mxu0 %v914_v47  ;;  %2274 = vmatprep.subr.mxu1 %v1107_v48  ;;  %v1300_v23 = vmax.f32 %v1296_v5, 0.0  ;;  %v1299_v26 = vmax.f32 %v1295_v19, 0.0  ;;  %v1298_v17 = vmax.f32 %v1294_v31, 0.0  ;;  %v1870_v59 = vmul.f32 %v2925_v22, %v2813_v52 }
  0xaa   : > { %2261 = vmatpush3.msra.mxu0 %v914_v47  ;;  %2275 = vmatpush3.msra.mxu1 %v1107_v48  ;;  %v1678_v47 = vmul.f32 %v1674_v21, %v2803_v46  ;;  %v1871_v48 = vmul.f32 %v2925_v22, %v2803_v46  ;;  %v1486_v50 = vadd.f32 %v1482_v43, %v2841_v8  ;;  %v1491_v44 = vmax.f32 %v1487_v37, 0.0 }
  0xab   : > { %2262 = vmatprep.subr.mxu0 %v913_v55  ;;  %2276 = vmatprep.subr.mxu1 %v1106_v56  ;;  %v1297_v54 = vmax.f32 %v1293_v49, 0.0  ;;  %v1874_v57 = vadd.f32 %v1870_v59, %v2824_v60  ;;  %v1869_v1 = vmul.f32 %v2925_v22, %v2815_v53  ;;  %v1675_v2 = vmul.f32 %v1674_v21, %v2826_v61 }
  0xac   : > { %2243 = vmatprep.mubr.msk.f32.mxu0 %vm467_vm0, %v2886_v58  ;;  %2257 = vmatprep.mubr.msk.f32.mxu1 %vm467_vm0, %v2886_v58  ;;  %v1682_v46 = vadd.f32 %v1678_v47, %v2801_v45  ;;  %v1875_v51 = vadd.f32 %v1871_v48, %v2801_v45  ;;  %v1676_v45 = vmul.f32 %v1674_v21, %v2815_v53 }
  0xad   : > { %2263 = vmatpush3.msra.mxu0 %v913_v55  ;;  %2277 = vmatpush3.msra.mxu1 %v1106_v56  ;;  %v1490_v55 = vmax.f32 %v1486_v50, 0.0  ;;  %v1677_v56 = vmul.f32 %v1674_v21, %v2813_v52  ;;  %v1873_v5 = vadd.f32 %v1869_v1, %v2839_v7  ;;  %v1868_v6 = vmul.f32 %v2925_v22, %v2826_v61 }
  0xae   : > { %2244 = vmatmul.mubr.msk.f32.gmra.mxu0 %vm467_vm0, %v2895_v62  ;;  %2258 = vmatmul.mubr.msk.f32.gmra.mxu1 %vm467_vm0, %v2895_v62  ;;  %v1686_v0 = vmax.f32 %v1682_v46, 0.0  ;;  %v1879_v52 = vmax.f32 %v1875_v51, 0.0  ;;  %v1679_v53 = vadd.f32 %v1675_v2, %v2841_v8 }
  0xaf   : > { %2264 = vmatprep.subr.mxu0 %v912_v3  ;;  %2278 = vmatprep.subr.mxu1 %v1105_v4  ;;  %v1681_v63 = vadd.f32 %v1677_v56, %v2824_v60  ;;  %v1680_v60 = vadd.f32 %v1676_v45, %v2839_v7  ;;  %v1872_v9 = vadd.f32 %v1868_v6, %v2841_v8  ;;  %v1877_v10 = vmax.f32 %v1873_v5, 0.0 }
  0xb0   : > { %2265 = vmatpush3.msra.mxu0 %v912_v3  ;;  %2279 = vmatpush3.msra.mxu1 %v1105_v4  ;;  %v1878_v4 = vmax.f32 %v1874_v57, 0.0  ;;  %v1683_v61 = vmax.f32 %v1679_v53, 0.0 }
  0xb1   : > { %2266 = vmatprep.subr.mxu0 %v911_v11  ;;  %2280 = vmatprep.subr.mxu1 %v1104_v13  ;;  %v1685_v3 = vmax.f32 %v1681_v63, 0.0  ;;  %v1684_v7 = vmax.f32 %v1680_v60, 0.0  ;;  %v1876_v8 = vmax.f32 %v1872_v9, 0.0 }
  0xb2   : > { %2267 = vmatpush3.msra.mxu0 %v911_v11  ;;  %2268 = vmatprep.mubr.msk.f32.mxu0 %vm467_vm0, %v2660_v12 }
  0xb3   : > { %2281 = vmatpush3.msra.mxu1 %v1104_v13  ;;  %2282 = vmatprep.mubr.msk.f32.mxu1 %vm467_vm0, %v2660_v12 }
  0xb4   : > { %2269 = vmatmul.mubr.msk.f32.vlgmr.msra.gmra.mxu0 %vm467_vm0, %v2863_v40  ;;  %2283 = vmatmul.mubr.msk.f32.vlgmr.msra.gmra.mxu1 %vm467_vm0, %v2863_v40 }
  0xb5   : > { %2288 = vmatprep.subr.mxu0 %v1300_v23  ;;  %2302 = vmatprep.subr.mxu1 %v1493_v24 }
  0xb6   : > { %2289 = vmatpush3.msra.mxu0 %v1300_v23  ;;  %2303 = vmatpush3.msra.mxu1 %v1493_v24 }
  0xb7   : > { %2290 = vmatprep.subr.mxu0 %v1299_v26  ;;  %2304 = vmatprep.subr.mxu1 %v1492_v42 }
  0xb8   : > { %2271 = vmatprep.mubr.msk.f32.mxu0 %vm467_vm0, %v2886_v58  ;;  %2285 = vmatprep.mubr.msk.f32.mxu1 %vm467_vm0, %v2886_v58 }
  0xb9   : > { %2291 = vmatpush3.msra.mxu0 %v1299_v26  ;;  %2305 = vmatpush3.msra.mxu1 %v1492_v42  ;;  %v389_v26 = vld [vmem:[#allocation2] sm:$0x1] }
  0xba   : > { %2272 = vmatmul.mubr.msk.f32.gmra.mxu0 %vm467_vm0, %v2895_v62  ;;  %2286 = vmatmul.mubr.msk.f32.gmra.mxu1 %vm467_vm0, %v2895_v62  ;;  %2344 = vpush %v389_v26 }
  0xbb   : > { %2292 = vmatprep.subr.mxu0 %v1298_v17  ;;  %2306 = vmatprep.subr.mxu1 %v1491_v44 }
  0xbc   : > { %2293 = vmatpush3.msra.mxu0 %v1298_v17  ;;  %2307 = vmatpush3.msra.mxu1 %v1491_v44 }
  0xbd   : > { %2294 = vmatprep.subr.mxu0 %v1297_v54  ;;  %2308 = vmatprep.subr.mxu1 %v1490_v55 }
  0xbe   : > { %2295 = vmatpush3.msra.mxu0 %v1297_v54  ;;  %2296 = vmatprep.mubr.msk.f32.mxu0 %vm467_vm0, %v2660_v12 }
  0xbf   : > { %2309 = vmatpush3.msra.mxu1 %v1490_v55  ;;  %2310 = vmatprep.mubr.msk.f32.mxu1 %vm467_vm0, %v2660_v12 }
  0xc0   : > { %2297 = vmatmul.mubr.msk.f32.vlgmr.msra.gmra.mxu0 %vm467_vm0, %v2863_v40  ;;  %2311 = vmatmul.mubr.msk.f32.vlgmr.msra.gmra.mxu1 %vm467_vm0, %v2863_v40 }
  0xc1   : > { %2316 = vmatprep.subr.mxu0 %v1686_v0  ;;  %2330 = vmatprep.subr.mxu1 %v1879_v52 }
  0xc2   : > { %2317 = vmatpush3.msra.mxu0 %v1686_v0  ;;  %2331 = vmatpush3.msra.mxu1 %v1879_v52 }
  0xc3   : > { %2318 = vmatprep.subr.mxu0 %v1685_v3  ;;  %2332 = vmatprep.subr.mxu1 %v1878_v4 }
  0xc4   : > { %2299 = vmatprep.mubr.msk.f32.mxu0 %vm467_vm0, %v2886_v58  ;;  %2313 = vmatprep.mubr.msk.f32.mxu1 %vm467_vm0, %v2886_v58 }
  0xc5   : > { %2319 = vmatpush3.msra.mxu0 %v1685_v3  ;;  %2333 = vmatpush3.msra.mxu1 %v1878_v4 }
  0xc6   : > { %2300 = vmatmul.mubr.msk.f32.gmra.mxu0 %vm467_vm0, %v2895_v62  ;;  %2314 = vmatmul.mubr.msk.f32.gmra.mxu1 %vm467_vm0, %v2895_v62 }
  0xc7   : > { %2320 = vmatprep.subr.mxu0 %v1684_v7  ;;  %2334 = vmatprep.subr.mxu1 %v1877_v10 }
  0xc8   : > { %2321 = vmatpush3.msra.mxu0 %v1684_v7  ;;  %2335 = vmatpush3.msra.mxu1 %v1877_v10 }
  0xc9   : > { %2322 = vmatprep.subr.mxu0 %v1683_v61  ;;  %2336 = vmatprep.subr.mxu1 %v1876_v8 }
  0xca   : > { %2323 = vmatpush3.msra.mxu0 %v1683_v61  ;;  %2324 = vmatprep.mubr.msk.f32.mxu0 %vm467_vm0, %v2660_v12 }
  0xcb   : > { %2337 = vmatpush3.msra.mxu1 %v1876_v8  ;;  %2338 = vmatprep.mubr.msk.f32.mxu1 %vm467_vm0, %v2660_v12  ;;  %v3027_v12 = vpop.permute.xlu1 %454 }
  0xcc   : > { %2325 = vmatmul.mubr.msk.f32.vlgmr.msra.gmra.mxu0 %vm467_vm0, %v2863_v40  ;;  %2339 = vmatmul.mubr.msk.f32.vlgmr.msra.gmra.mxu1 %vm467_vm0, %v2863_v40 }
  0xcd   : > { %2327 = vmatprep.mubr.msk.f32.mxu0 %vm467_vm0, %v2886_v58  ;;  %2341 = vmatprep.mubr.msk.f32.mxu1 %vm467_vm0, %v2886_v58 }
  0xce   : > { %2413 = vset.pattern.permute.xlu1 %v2519_v38  ;;  %2427 = vset.pattern.permute.xlu0 %v2518_v36 }
  0xcf   : > { %1970 = vperm.xlu1 %2413, %v2680_v16   ;;  %1839 = vperm.xlu0 %2427, %v2728_v28   ;;  %v3032_v16 = vpop.permute.xlu1 %464 }
  0xd0   : > { %2328 = vmatmul.mubr.msk.f32.gmra.mxu0 %vm467_vm0, %v2895_v62  ;;  %2342 = vmatmul.mubr.msk.f32.gmra.mxu1 %vm467_vm0, %v2895_v62 }
  0xd3   : > { %2414 = vset.pattern.permute.xlu1 %v2518_v36  ;;  %2430 = vset.pattern.permute.xlu0 %v2519_v38 }
  0xd4   : > { %1785 = vperm.xlu1 %2414, %v2692_v18   ;;  %2028 = vperm.xlu0 %2430, %v2723_v27  }
  0xd8   : > { %2415 = vset.pattern.permute.xlu1 %v2519_v38  ;;  %2036 = vperm.xlu0 %2430, %v2735_v29  }
  0xd9   : > { %1978 = vperm.xlu1 %2415, %v2692_v18   ;;  %v573_v18 = vpop.permute.xlu1 %572 }
  0xdd   : > { %2417 = vset.pattern.permute.xlu1 %v2515_v33 }
  0xde   : > { %1260 = vperm.xlu1 %2417, %v2728_v28  }
  0xe2   : > { %2418 = vset.pattern.permute.xlu1 %v2514_v32  ;;  %v3039_v32 = vpop.permute.xlu1 %582 }
  0xe3   : > { %1075 = vperm.xlu1 %2418, %v2740_v30  }
  0xe7   : > { %2419 = vset.pattern.permute.xlu1 %v2516_v34 }
  0xe8   : > { %1449 = vperm.xlu1 %2419, %v2723_v27  }
  0xeb   : > { %s2345_s21 = spop %2344 }
  0xec   : > { %2421 = vset.pattern.permute.xlu1 %v2515_v33  ;;  %v3043_v33 = vpop.permute.xlu1 %631 }
  0xed   : > { %1268 = vperm.xlu1 %2421, %v2740_v30  }
  0xf1   : > { %2422 = vset.pattern.permute.xlu1 %v2516_v34 }
  0xf2   : > { %1457 = vperm.xlu1 %2422, %v2735_v29  }
  0xf6   : > { %2424 = vset.pattern.permute.xlu1 %v2517_v35 }
  0xf7   : > { %1646 = vperm.xlu1 %2424, %v2728_v28  }
  0xfb   : > { %2425 = vset.pattern.permute.xlu1 %v2516_v34  ;;  %v3051_v34 = vpop.permute.xlu0 %449 }
  0xfc   : > { %1461 = vperm.xlu1 %2425, %v2740_v30  }
 0x100   : > { %2426 = vset.pattern.permute.xlu1 %v2518_v36 }
 0x101   : > { %1835 = vperm.xlu1 %2426, %v2723_v27   ;;  %v3047_v27 = vpop.permute.xlu1 %641 }
 0x105   : > { %2428 = vset.pattern.permute.xlu1 %v2517_v35  ;;  %v3055_v35 = vpop.permute.xlu0 %459 }
 0x106   : > { %1654 = vperm.xlu1 %2428, %v2740_v30  }
 0x10a   : > { %2429 = vset.pattern.permute.xlu1 %v2518_v36 }
 0x10b   : > { %1843 = vperm.xlu1 %2429, %v2735_v29   ;;  %v3053_v29 = vpop.permute.xlu1 %655 }
 0x10f   : > { %2431 = vset.pattern.permute.xlu1 %v2519_v38  ;;  %v3057_v40 = vpop.permute.xlu1 %665 }
 0x110   : > { %2032 = vperm.xlu1 %2431, %v2728_v28   ;;  %v568_v28 = vpop.permute.xlu0 %567 }
 0x113   : > { %v3059_v58 = vpop.permute.xlu1 %679 }
 0x114   : > { %2432 = vset.pattern.permute.xlu1 %v2518_v36  ;;  %3584 = vst [vmem:[#allocation6_spill] sm:$0xff] %v3059_v58  ;;  %v578_v36 = vpop.permute.xlu0 %577 }
 0x115   : > { %1847 = vperm.xlu1 %2432, %v2740_v30  }
 0x117   : > { %v3061_v62 = vpop.permute.xlu1 %689 }
 0x118   : > { %3585 = vst [vmem:[#allocation7_spill] sm:$0xff] %v3061_v62  ;;  %v3063_v11 = vpop.permute.xlu0 %626 }
 0x119   : > { %2433 = vset.pattern.permute.xlu1 %v2519_v38 }
 0x11a   : > { %2040 = vperm.xlu1 %2433, %v2740_v30  }
 0x11b   : > { %v813_v13 = vpop.permute.xlu1 %812 }
 0x11c   : > { %v3065_v38 = vpop.permute.xlu0 %636 }
 0x11f   : > { %v817_v30 = vpop.permute.xlu1 %816 }
 0x120   : > { %v3067_v14 = vpop.permute.xlu0 %650 }
 0x123   : > { %v3069_v15 = vpop.permute.xlu1 %870 }
 0x124   : > { %3586 = vst [vmem:[#allocation8_spill] sm:$0xff] %v3069_v15  ;;  %v3071_v19 = vpop.permute.xlu0 %660 }
 0x127   : > { %v3073_v20 = vpop.permute.xlu1 %878 }
 0x128   : > { %3587 = vst [vmem:[#allocation9_spill] sm:$0xff] %v3073_v20  ;;  %v3075_v39 = vpop.permute.xlu0 %674 }
 0x12b   : > { %v3077_v21 = vpop.permute.xlu1 %1001 }
 0x12c   : > { %v3079_v22 = vpop.permute.xlu0 %684 }
 0x12d   : > { %3588 = vst [vmem:[#allocation10_spill] sm:$0xff] %v3079_v22 }
 0x12f   : > { %v3081_v23 = vpop.permute.xlu1 %1009 }
 0x130   : > { %v809_v24 = vpop.permute.xlu0 %808 }
 0x133   : > { %v3083_v25 = vpop.permute.xlu1 %1013 }
 0x134   : > { %v821_v31 = vpop.permute.xlu0 %820 }
 0x137   : > { %v3085_v42 = vpop.permute.xlu1 %1067 }
 0x138   : > { %3589 = vst [vmem:[#allocation11_spill] sm:$0xff] %v3085_v42  ;;  %v3087_v37 = vpop.permute.xlu0 %874 }
 0x139   : > { %3590 = vst [vmem:[#allocation12_spill] sm:$0xff] %v3087_v37 }
 0x13b   : > { %v1195_v41 = vpop.permute.xlu1 %1194 }
 0x13c   : > { %v3089_v48 = vpop.permute.xlu0 %882 }
 0x13d   : > { %3591 = vst [vmem:[#allocation13_spill] sm:$0xff] %v3089_v48 }
 0x13f   : > { %v3091_v49 = vpop.permute.xlu1 %1202 }
 0x140   : > { %v1006_v55 = vpop.permute.xlu0 %1005 }
 0x143   : > { %v3097_v56 = vpop.permute.xlu1 %1387 }
 0x144   : > { %v3111_v6 = vpop.permute.xlu0 %1063 }
 0x145   : > { %3592 = vst [vmem:[#allocation14_spill] sm:$0xff] %v3111_v6 }
 0x147   : > { %v1207_v53 = vpop.permute.xlu1 %1206 }
 0x168   : > { %v2242_v43 = vpop.f32.mrf.mxu0  ;;  %v2256_v47 = vpop.f32.mrf.mxu1 }
 0x169   : > { %v552_v51 = vadd.f32 %v2242_v43, %v3027_v12  ;;  %v794_v54 = vadd.f32 %v2256_v47, %v3027_v12 }
 0x16a   : > { %v546_v50 = vpop.f32.mrf.mxu0  ;;  %v788_v17 = vpop.f32.mrf.mxu1 }
 0x16b   : > { %v547_v44 = vadd.f32 %v546_v50, %v3051_v34  ;;  %v789_v46 = vadd.f32 %v788_v17, %v3051_v34  ;;  %v3103_v0 = vadd.f32 %v573_v18, %v552_v51  ;;  %v3105_v52 = vadd.f32 %v813_v13, %v794_v54 }
 0x16d   : > { %v3099_v57 = vadd.f32 %v568_v28, %v547_v44  ;;  %v3101_v45 = vadd.f32 %v809_v24, %v789_v46  ;;  %v3132_v44 = vpop.permute.xlu0 %1071 }
 0x16e   : > { %v2245_v59 = vpop.f32.mrf.mxu0  ;;  %v2259_v63 = vpop.f32.mrf.mxu1  ;;  %3593 = vst [vmem:[#allocation15_spill] sm:$0xff] %v3132_v44 }
 0x16f   : > { %v562_v2 = vadd.f32 %v2245_v59, %v3032_v16  ;;  %v804_v3 = vadd.f32 %v2259_v63, %v3032_v16  ;;  %v589_v9 = vadd.f32 %v3103_v0, %v3099_v57  ;;  %v827_v7 = vadd.f32 %v3105_v52, %v3101_v45 }
 0x170   : > { %v556_v1 = vpop.f32.mrf.mxu0  ;;  %v798_v60 = vpop.f32.mrf.mxu1 }
 0x171   : > { %v557_v4 = vadd.f32 %v556_v1, %v3055_v35  ;;  %v799_v5 = vadd.f32 %v798_v60, %v3055_v35  ;;  %v3122_v28 = vadd.f32 %v3039_v32, %v562_v2  ;;  %v3124_v13 = vadd.f32 %v821_v31, %v804_v3  ;;  %v3134_v32 = vpop.permute.xlu1 %1395 }
 0x173   : > { %v3117_v10 = vadd.f32 %v578_v36, %v557_v4  ;;  %v3119_v61 = vadd.f32 %v817_v30, %v799_v5 }
 0x174   : > { %v2270_v8 = vpop.f32.mrf.mxu0  ;;  %v2284_v18 = vpop.f32.mrf.mxu1 }
 0x175   : > { %v590_v24 = vadd.f32 %v589_v9, %v3117_v10  ;;  %v828_v26 = vadd.f32 %v827_v7, %v3119_v61  ;;  %v987_v51 = vadd.f32 %v2270_v8, %v3027_v12  ;;  %v1180_v54 = vadd.f32 %v2284_v18, %v3027_v12  ;;  %v1199_v9 = vpop.permute.xlu0 %1198 }
 0x176   : > { %v981_v43 = vpop.f32.mrf.mxu0  ;;  %v1174_v47 = vpop.f32.mrf.mxu1 }
 0x177   : > { %v591_v50 = vadd.f32 %v590_v24, %v3122_v28  ;;  %v829_v36 = vadd.f32 %v828_v26, %v3124_v13  ;;  %v982_v30 = vadd.f32 %v981_v43, %v3051_v34  ;;  %v1175_v17 = vadd.f32 %v1174_v47, %v3051_v34 }
 0x178   : > { %v3143_v26 = vadd.f32 %v1006_v55, %v987_v51  ;;  %v3146_v43 = vadd.f32 %v1199_v9, %v1180_v54 }
 0x179   : > { %v592_v31 = vrot.slane %v591_v50, 4  ;;  %v830_v46 = vrot.slane %v829_v36, 4  ;;  %v3139_v2 = vadd.f32 %v3077_v21, %v982_v30  ;;  %v3141_v3 = vadd.f32 %v1195_v41, %v1175_v17 }
 0x17a   : > { %v2273_v59 = vpop.f32.mrf.mxu0  ;;  %v2287_v63 = vpop.f32.mrf.mxu1 }
 0x17b   : > { %v593_v1 = vadd.f32 %v592_v31, %v591_v50  ;;  %v831_v60 = vadd.f32 %v830_v46, %v829_v36  ;;  %v997_v8 = vadd.f32 %v2273_v59, %v3032_v16  ;;  %v1190_v18 = vadd.f32 %v2287_v63, %v3032_v16  ;;  %v1585_v50 = vpop.permute.xlu1 %1584 }
 0x17c   : > { %v991_v4 = vpop.f32.mrf.mxu0  ;;  %v1184_v5 = vpop.f32.mrf.mxu1  ;;  %v1020_v30 = vadd.f32 %v3143_v26, %v3139_v2  ;;  %v1213_v55 = vadd.f32 %v3146_v43, %v3141_v3 }
 0x17d   : > { %v594_v7 = vrot.slane %v593_v1, 2  ;;  %v832_v24 = vrot.slane %v831_v60, 2  ;;  %v992_v47 = vadd.f32 %v991_v4, %v3055_v35  ;;  %v1185_v21 = vadd.f32 %v1184_v5, %v3055_v35 }
 0x17e   : > { %v3162_v63 = vadd.f32 %v3083_v25, %v997_v8 }
 0x17f   : > { %v595_v41 = vadd.f32 %v594_v7, %v593_v1  ;;  %v833_v36 = vadd.f32 %v832_v24, %v831_v60  ;;  %v3156_v17 = vadd.f32 %v3081_v23, %v992_v47  ;;  %v3159_v31 = vadd.f32 %v3091_v49, %v1185_v21  ;;  %v1392_v49 = vpop.permute.xlu0 %1391  ;;  %v1400_v44 = vpop.permute.xlu1 %1399 }
 0x180   : > { %v2298_v46 = vpop.f32.mrf.mxu0  ;;  %v2312_v51 = vpop.f32.mrf.mxu1  ;;  %v3164_v1 = vadd.f32 %v1207_v53, %v1190_v18 }
 0x181   : > { %v596_v54 = vrot.slane %v595_v41, 1  ;;  %v834_v59 = vrot.slane %v833_v36, 1  ;;  %v1021_v60 = vadd.f32 %v1020_v30, %v3156_v17  ;;  %v1214_v4 = vadd.f32 %v1213_v55, %v3159_v31 }
 0x182   : > { %v1373_v5 = vadd.f32 %v2298_v46, %v3027_v12  ;;  %v1367_v23 = vpop.f32.mrf.mxu0  ;;  %v1560_v24 = vpop.f32.mrf.mxu1  ;;  %v1566_v53 = vadd.f32 %v2312_v51, %v3027_v12 }
 0x183   : > { %v597_v9 = vadd.f32 %v596_v54, %v595_v41  ;;  %v835_v7 = vadd.f32 %v834_v59, %v833_v36  ;;  %v1022_v47 = vadd.f32 %v1021_v60, %v3162_v63  ;;  %v1215_v21 = vadd.f32 %v1214_v4, %v3164_v1 }
 0x184   : > { %v1368_v18 = vadd.f32 %v1367_v23, %v3051_v34  ;;  %v3173_v42 = vadd.f32 %v1392_v49, %v1373_v5  ;;  %v1561_v41 = vadd.f32 %v1560_v24, %v3051_v34 }
 0x185   : > { %v599_v25 = vmul.f32 0.03125, %v597_v9  ;;  %v836_v8 = vmul.f32 0.03125, %v835_v7  ;;  %v1023_v30 = vrot.slane %v1022_v47, 4  ;;  %v1216_v55 = vrot.slane %v1215_v21, 4 }
 0x186   : > { %v2301_v36 = vpop.f32.mrf.mxu0  ;;  %v2315_v60 = vpop.f32.mrf.mxu1  ;;  %v3204_v9 = vadd.f32 %v1585_v50, %v1566_v53 }
 0x187   : > { %v3177_v46 = vsub.f32 %v3099_v57, %v599_v25  ;;  %v3180_v54 = vsub.f32 %v3103_v0, %v599_v25  ;;  %v3183_v59 = vsub.f32 %v3117_v10, %v599_v25  ;;  %v3186_v51 = vsub.f32 %v3122_v28, %v599_v25  ;;  %v1581_v28 = vpop.permute.xlu0 %1580  ;;  %v3219_v25 = vpop.permute.xlu1 %1773 }
 0x188   : > { %v3189_v4 = vsub.f32 %v3101_v45, %v836_v8  ;;  %v3192_v5 = vsub.f32 %v3105_v52, %v836_v8  ;;  %v3195_v23 = vsub.f32 %v3119_v61, %v836_v8  ;;  %v3198_v57 = vsub.f32 %v3124_v13, %v836_v8  ;;  %v1377_v49 = vpop.f32.mrf.mxu0  ;;  %v1570_v53 = vpop.f32.mrf.mxu1 }
 0x189   : > { %v604_v0 = vmul.f32 %v3177_v46, %v3177_v46  ;;  %v605_v10 = vmul.f32 %v3180_v54, %v3180_v54  ;;  %v3207_v45 = vadd.f32 %v3097_v56, %v1368_v18  ;;  %v606_v52 = vmul.f32 %v3183_v59, %v3183_v59 }
 0x18a   : > { %v841_v61 = vmul.f32 %v3189_v4, %v3189_v4  ;;  %v842_v13 = vmul.f32 %v3192_v5, %v3192_v5  ;;  %v3215_v7 = vadd.f32 %v1581_v28, %v1561_v41  ;;  %v607_v24 = vmul.f32 %v3186_v51, %v3186_v51 }
 0x18b   : > { %v608_v50 = vadd.f32 %v605_v10, %v604_v0  ;;  %v1024_v56 = vadd.f32 %v1023_v30, %v1022_v47  ;;  %v1217_v8 = vadd.f32 %v1216_v55, %v1215_v21  ;;  %v843_v18 = vmul.f32 %v3195_v23, %v3195_v23  ;;  %v1589_v22 = vpop.permute.xlu0 %1588 }
 0x18c   : > { %v844_v6 = vmul.f32 %v3198_v57, %v3198_v57  ;;  %v845_v48 = vadd.f32 %v842_v13, %v841_v61  ;;  %v1383_v41 = vadd.f32 %v2301_v36, %v3032_v16  ;;  %v1378_v37 = vadd.f32 %v1377_v49, %v3055_v35 }
 0x18d   : > { %v609_v28 = vadd.f32 %v608_v50, %v606_v52  ;;  %v1025_v20 = vrot.slane %v1024_v56, 2  ;;  %v1218_v62 = vrot.slane %v1217_v8, 2  ;;  %v1406_v47 = vadd.f32 %v3173_v42, %v3207_v45  ;;  %v1593_v50 = vpop.permute.xlu1 %1592 }
 0x18e   : > { %v846_v0 = vadd.f32 %v845_v48, %v843_v18  ;;  %v1576_v21 = vadd.f32 %v2315_v60, %v3032_v16  ;;  %v1571_v30 = vadd.f32 %v1570_v53, %v3055_v35  ;;  %v3232_v61 = vadd.f32 %v3134_v32, %v1378_v37 }
 0x18f   : > { %v610_v55 = vadd.f32 %v609_v28, %v607_v24  ;;  %v1026_v10 = vadd.f32 %v1025_v20, %v1024_v56  ;;  %v1219_v15 = vadd.f32 %v1218_v62, %v1217_v8  ;;  %v1599_v52 = vadd.f32 %v3204_v9, %v3215_v7 }
 0x190   : > { %v847_v36 = vadd.f32 %v846_v0, %v844_v6  ;;  %v3236_v13 = vadd.f32 %v1400_v44, %v1383_v41  ;;  %v3238_v48 = vadd.f32 %v1589_v22, %v1571_v30  ;;  %v1407_v24 = vadd.f32 %v1406_v47, %v3232_v61  ;;  %v2326_v0 = vpop.f32.mrf.mxu0 }
 0x191   : > { %v611_v49 = vrot.slane %v610_v55, 4  ;;  %v1027_v60 = vrot.slane %v1026_v10, 1  ;;  %v1220_v18 = vrot.slane %v1219_v15, 1  ;;  %v3241_v62 = vadd.f32 %v1593_v50, %v1576_v21 }
 0x192   : > { %v848_v20 = vrot.slane %v847_v36, 4  ;;  %v1600_v37 = vadd.f32 %v1599_v52, %v3238_v48  ;;  %v1408_v8 = vadd.f32 %v1407_v24, %v3236_v13 }
 0x193   : > { %v612_v32 = vadd.f32 %v611_v49, %v610_v55  ;;  %v1028_v6 = vadd.f32 %v1027_v60, %v1026_v10  ;;  %v1221_v56 = vadd.f32 %v1220_v18, %v1219_v15 }
 0x194   : > { %v849_v44 = vadd.f32 %v848_v20, %v847_v36  ;;  %v1601_v28 = vadd.f32 %v1600_v37, %v3241_v62  ;;  %v1409_v58 = vrot.slane %v1408_v8, 4 }
 0x195   : > { %v613_v53 = vrot.slane %v612_v32, 2  ;;  %v1029_v22 = vmul.f32 0.03125, %v1028_v6  ;;  %v1222_v41 = vmul.f32 0.03125, %v1221_v56 }
 0x196   : > { %v850_v30 = vrot.slane %v849_v44, 2  ;;  %v1602_v60 = vrot.slane %v1601_v28, 4 }
 0x197   : > { %v614_v47 = vadd.f32 %v613_v53, %v612_v32  ;;  %v3247_v21 = vsub.f32 %v3139_v2, %v1029_v22  ;;  %v3250_v52 = vsub.f32 %v3143_v26, %v1029_v22  ;;  %v3253_v15 = vsub.f32 %v3156_v17, %v1029_v22  ;;  %v1753_v17 = vpop.f32.mrf.mxu0 }
 0x198   : > { %v851_v55 = vadd.f32 %v850_v30, %v849_v44  ;;  %v3256_v10 = vsub.f32 %v3162_v63, %v1029_v22  ;;  %v3259_v36 = vsub.f32 %v3141_v3, %v1222_v41  ;;  %v3262_v49 = vsub.f32 %v3146_v43, %v1222_v41  ;;  %v1782_v43 = vpop.permute.xlu1 %1781 }
 0x199   : > { %3594 = vst [vmem:[#allocation16_spill] sm:$0xff] %v3247_v21  ;;  %3595 = vst [vmem:[#allocation17_spill] sm:$0xff] %v3250_v52  ;;  %v615_v50 = vrot.slane %v614_v47, 1  ;;  %v1034_v2 = vmul.f32 %v3247_v21, %v3247_v21  ;;  %v1035_v26 = vmul.f32 %v3250_v52, %v3250_v52  ;;  %v1036_v63 = vmul.f32 %v3253_v15, %v3253_v15 }
 0x19a   : > { %3596 = vst [vmem:[#allocation18_spill] sm:$0xff] %v3253_v15  ;;  %3597 = vst [vmem:[#allocation19_spill] sm:$0xff] %v3256_v10  ;;  %v852_v18 = vrot.slane %v851_v55, 1  ;;  %v3271_v24 = vsub.f32 %v3159_v31, %v1222_v41  ;;  %v3274_v3 = vsub.f32 %v3164_v1, %v1222_v41  ;;  %v1227_v32 = vmul.f32 %v3259_v36, %v3259_v36 }
 0x19b   : > { %3598 = vst [vmem:[#allocation20_spill] sm:$0xff] %v3259_v36  ;;  %3599 = vst [vmem:[#allocation21_spill] sm:$0xff] %v3262_v49  ;;  %v616_v20 = vadd.f32 %v615_v50, %v614_v47  ;;  %v1038_v37 = vadd.f32 %v1035_v26, %v1034_v2  ;;  %v1228_v6 = vmul.f32 %v3262_v49, %v3262_v49  ;;  %v2340_v47 = vpop.f32.mrf.mxu1  ;;  %v2329_v50 = vpop.f32.mrf.mxu0 }
 0x19c   : > { %3600 = vst [vmem:[#allocation22_spill] sm:$0xff] %v3271_v24  ;;  %v853_v56 = vadd.f32 %v852_v18, %v851_v55  ;;  %v1037_v44 = vmul.f32 %v3256_v10, %v3256_v10  ;;  %v1229_v31 = vmul.f32 %v3271_v24, %v3271_v24  ;;  %v1410_v53 = vadd.f32 %v1409_v58, %v1408_v8  ;;  %v1971_v10 = vpop.permute.xlu1 %1970 }
 0x19d   : > { %v617_v22 = vmul.f32 0.03125, %v616_v20  ;;  %v1039_v1 = vadd.f32 %v1038_v37, %v1036_v63  ;;  %v1231_v41 = vadd.f32 %v1228_v6, %v1227_v32  ;;  %v1603_v30 = vadd.f32 %v1602_v60, %v1601_v28  ;;  %v1946_v8 = vpop.f32.mrf.mxu1  ;;  %v1763_v63 = vpop.f32.mrf.mxu0 }
 0x19e   : > { %v854_v2 = vmul.f32 0.03125, %v853_v56  ;;  %v1411_v26 = vrot.slane %v1410_v53, 2  ;;  %v1230_v52 = vmul.f32 %v3274_v3, %v3274_v3  ;;  %v1754_v60 = vadd.f32 %v1753_v17, %v3051_v34  ;;  %v1778_v56 = vpop.permute.xlu0 %1777 }
 0x19f   : > { %v1040_v36 = vadd.f32 %v1039_v1, %v1037_v44  ;;  %v1232_v55 = vadd.f32 %v1231_v41, %v1229_v31  ;;  %v1604_v18 = vrot.slane %v1603_v30, 2  ;;  %v618_v21 = vadd.f32 1e-05, %v617_v22  ;;  %v2343_v41 = vpop.f32.mrf.mxu1 }
 0x1a0   : > { %v1412_v49 = vadd.f32 %v1411_v26, %v1410_v53  ;;  %v855_v20 = vadd.f32 1e-05, %v854_v2  ;;  %v1759_v44 = vadd.f32 %v2326_v0, %v3027_v12  ;;  %v1764_v22 = vadd.f32 %v1763_v63, %v3055_v35  ;;  %v1786_v2 = vpop.permute.xlu1 %1785 }
 0x1a1   : > { %v1041_v15 = vrot.slane %v1040_v36, 4  ;;  %v1233_v24 = vadd.f32 %v1232_v55, %v1230_v52  ;;  %v1605_v58 = vadd.f32 %v1604_v18, %v1603_v30  ;;  %2434 = vrsqrt.f32 %v618_v21  ;;  %v1956_v18 = vpop.f32.mrf.mxu1 }
 0x1a2   : > { %v1413_v28 = vrot.slane %v1412_v49, 1  ;;  %2436 = vrsqrt.f32 %v855_v20  ;;  %v3290_v26 = vadd.f32 %v3219_v25, %v1754_v60  ;;  %v3292_v17 = vadd.f32 %v1778_v56, %v1759_v44  ;;  %v1967_v55 = vpop.permute.xlu0 %1966 }
 0x1a3   : > { %v1042_v37 = vadd.f32 %v1041_v15, %v1040_v36  ;;  %v1234_v32 = vrot.slane %v1233_v24, 4  ;;  %v1606_v6 = vrot.slane %v1605_v58, 1  ;;  %v1947_v63 = vadd.f32 %v1946_v8, %v3051_v34 }
 0x1a4   : > { %v1414_v31 = vadd.f32 %v1413_v28, %v1412_v49  ;;  %v1792_v25 = vadd.f32 %v3292_v17, %v3290_v26  ;;  %v1769_v20 = vadd.f32 %v2329_v50, %v3032_v16  ;;  %v1957_v34 = vadd.f32 %v1956_v18, %v3055_v35 }
 0x1a5   : > { %v1043_v53 = vrot.slane %v1042_v37, 2  ;;  %v1235_v1 = vadd.f32 %v1234_v32, %v1233_v24  ;;  %v1607_v52 = vadd.f32 %v1606_v6, %v1605_v58  ;;  %v3300_v24 = vadd.f32 %v1782_v43, %v1764_v22 }
 0x1a6   : > { %v1415_v30 = vmul.f32 0.03125, %v1414_v31  ;;  %v1952_v58 = vadd.f32 %v2340_v47, %v3027_v12  ;;  %v1979_v47 = vpop.permute.xlu1 %1978  ;;  %v3324_v32 = vadd.f32 %v1967_v55, %v1947_v63  ;;  %v3326_v6 = vadd.f32 %v1786_v2, %v1769_v20  ;;  %v1975_v22 = vpop.permute.xlu0 %1974 }
 0x1a7   : > { %v1044_v15 = vadd.f32 %v1043_v53, %v1042_v37  ;;  %v1236_v36 = vrot.slane %v1235_v1, 2  ;;  %v1608_v49 = vmul.f32 0.03125, %v1607_v52  ;;  %v1793_v37 = vadd.f32 %v1792_v25, %v3300_v24 }
 0x1a8   : > { %v3295_v0 = vsub.f32 %v3207_v45, %v1415_v30  ;;  %v3298_v21 = vsub.f32 %v3173_v42, %v1415_v30  ;;  %v3320_v50 = vsub.f32 %v3232_v61, %v1415_v30  ;;  %v3322_v8 = vadd.f32 %v1971_v10, %v1952_v58 }
 0x1a9   : > { %v1045_v28 = vrot.slane %v1044_v15, 1  ;;  %v1237_v45 = vadd.f32 %v1236_v36, %v1235_v1  ;;  %v3312_v60 = vsub.f32 %v3215_v7, %v1608_v49  ;;  %v3315_v12 = vsub.f32 %v3204_v9, %v1608_v49 }
 0x1aa   : > { %v1420_v42 = vmul.f32 %v3295_v0, %v3295_v0  ;;  %v1421_v43 = vmul.f32 %v3298_v21, %v3298_v21  ;;  %v1962_v7 = vadd.f32 %v2343_v41, %v3032_v16  ;;  %v3330_v9 = vsub.f32 %v3236_v13, %v1415_v30  ;;  %v3339_v1 = vpop.permute.xlu1 %1260 }
 0x1ab   : > { %v1046_v56 = vadd.f32 %v1045_v28, %v1044_v15  ;;  %v1238_v44 = vrot.slane %v1237_v45, 1  ;;  %v1613_v35 = vmul.f32 %v3312_v60, %v3312_v60  ;;  %v1614_v61 = vmul.f32 %v3315_v12, %v3315_v12 }
 0x1ac   : > { %v1424_v31 = vadd.f32 %v1421_v43, %v1420_v42  ;;  %v1794_v10 = vadd.f32 %v1793_v37, %v3326_v6  ;;  %v3337_v53 = vadd.f32 %v1975_v22, %v1957_v34  ;;  %v1422_v52 = vmul.f32 %v3320_v50, %v3320_v50 }
 0x1ad   : > { %v3344_v13 = vsub.f32 %v3238_v48, %v1608_v49  ;;  %v3347_v41 = vsub.f32 %v3241_v62, %v1608_v49  ;;  %v1985_v30 = vadd.f32 %v3322_v8, %v3324_v32  ;;  %v3351_v2 = vadd.f32 %v1979_v47, %v1962_v7 }
 0x1ae   : > { %v2435_v16 = vpop.eup %2434  ;;  %v1047_v36 = vmul.f32 0.03125, %v1046_v56  ;;  %v1239_v55 = vadd.f32 %v1238_v44, %v1237_v45  ;;  %v1423_v18 = vmul.f32 %v3330_v9, %v3330_v9  ;;  %v1425_v58 = vadd.f32 %v1424_v31, %v1422_v52  ;;  %v3367_v37 = vpop.permute.xlu1 %1075 }
 0x1af   : > { %v2437_v15 = vpop.eup %2436  ;;  %v620_v25 = vmul.f32 %v2435_v16, %v3177_v46  ;;  %v1617_v63 = vadd.f32 %v1614_v61, %v1613_v35  ;;  %v1795_v48 = vrot.slane %v1794_v10, 4  ;;  %v1986_v20 = vadd.f32 %v1985_v30, %v3337_v53 }
 0x1b0   : > { %v621_v62 = vmul.f32 %v2435_v16, %v3180_v54  ;;  %v622_v49 = vmul.f32 %v2435_v16, %v3183_v59  ;;  %v1615_v28 = vmul.f32 %v3344_v13, %v3344_v13  ;;  %v1616_v45 = vmul.f32 %v3347_v41, %v3347_v41 }
 0x1b1   : > { %v623_v42 = vmul.f32 %v2435_v16, %v3186_v51  ;;  %v857_v43 = vmul.f32 %v2437_v15, %v3189_v4  ;;  %v858_v46 = vmul.f32 %v2437_v15, %v3192_v5  ;;  %v859_v47 = vmul.f32 %v2437_v15, %v3195_v23 }
 0x1b2   : > { %v860_v54 = vmul.f32 %v2437_v15, %v3198_v57  ;;  %v1048_v34 = vadd.f32 1e-05, %v1047_v36  ;;  %v1240_v59 = vmul.f32 0.03125, %v1239_v55  ;;  %v1426_v7 = vadd.f32 %v1425_v58, %v1423_v18  ;;  %v3377_v18 = vpop.permute.xlu1 %1449 }
 0x1b3   : > { %v644_v56 = vmul.f32 %v3063_v11, %v620_v25  ;;  %v1618_v44 = vadd.f32 %v1617_v63, %v1615_v28  ;;  %v1796_v31 = vadd.f32 %v1795_v48, %v1794_v10  ;;  %v1987_v22 = vadd.f32 %v1986_v20, %v3351_v2 }
 0x1b4   : > { %v645_v51 = vmul.f32 %v3043_v33, %v621_v62  ;;  %2438 = vrsqrt.f32 %v1048_v34  ;;  %v1241_v4 = vadd.f32 1e-05, %v1240_v59  ;;  %v1427_v5 = vrot.slane %v1426_v7, 4 }
 0x1b5   : > { %v646_v23 = vmul.f32 %v3065_v38, %v622_v49  ;;  %v1619_v35 = vadd.f32 %v1618_v44, %v1616_v45  ;;  %v1797_v61 = vrot.slane %v1796_v31, 2  ;;  %v1988_v16 = vrot.slane %v1987_v22, 4 }
 0x1b6   : > { %v861_v57 = vmul.f32 %v857_v43, %v3063_v11  ;;  %v862_v52 = vmul.f32 %v858_v46, %v3043_v33  ;;  %2440 = vrsqrt.f32 %v1241_v4  ;;  %v1428_v30 = vadd.f32 %v1427_v5, %v1426_v7 }
 0x1b7   : > { %v647_v10 = vmul.f32 %v3047_v27, %v623_v42  ;;  %v1620_v15 = vrot.slane %v1619_v35, 4  ;;  %v1798_v36 = vadd.f32 %v1797_v61, %v1796_v31  ;;  %v1989_v55 = vadd.f32 %v1988_v16, %v1987_v22  ;;  %v3601_v22 = vld [vmem:[#allocation6_spill] sm:$0xff] }
 0x1b8   : > { %v668_v58 = vadd.f32 %v3067_v14, %v644_v56  ;;  %v863_v25 = vmul.f32 %v859_v47, %v3065_v38  ;;  %v864_v63 = vmul.f32 %v860_v54, %v3047_v27  ;;  %v1429_v48 = vrot.slane %v1428_v30, 2  ;;  %v3602_v61 = vld [vmem:[#allocation10_spill] sm:$0xff] }
 0x1b9   : > { %v669_v20 = vadd.f32 %v3053_v29, %v645_v51  ;;  %v1621_v62 = vadd.f32 %v1620_v15, %v1619_v35  ;;  %v1799_v49 = vrot.slane %v1798_v36, 1  ;;  %v1990_v28 = vrot.slane %v1989_v55, 2  ;;  %v3391_v35 = vpop.permute.xlu1 %1268 }
 0x1ba   : > { %v670_v45 = vadd.f32 %v3071_v19, %v646_v23  ;;  %v865_v42 = vadd.f32 %v861_v57, %v3067_v14  ;;  %v866_v43 = vadd.f32 %v862_v52, %v3053_v29  ;;  %v1430_v46 = vadd.f32 %v1429_v48, %v1428_v30  ;;  %v3603_v57 = vld [vmem:[#allocation8_spill] sm:$0xff]  ;;  %v3606_v48 = vld [vmem:[#allocation9_spill] sm:$0xff] }
 0x1bb   : > { %v671_v34 = vadd.f32 %v3057_v40, %v647_v10  ;;  %v1622_v59 = vrot.slane %v1621_v62, 2  ;;  %v1800_v7 = vadd.f32 %v1799_v49, %v1798_v36  ;;  %v1991_v47 = vadd.f32 %v1990_v28, %v1989_v55  ;;  %v3604_v30 = vld [vmem:[#allocation12_spill] sm:$0xff] }
 0x1bc   : > { %v692_v54 = vmul.f32 %v3075_v39, %v668_v58  ;;  %v867_v56 = vadd.f32 %v863_v25, %v3071_v19  ;;  %v868_v44 = vadd.f32 %v864_v63, %v3057_v40  ;;  %v1431_v31 = vrot.slane %v1430_v46, 1  ;;  %v3605_v25 = vld [vmem:[#allocation7_spill] sm:$0xff] }
 0x1bd   : > { %v693_v51 = vmul.f32 %v3601_v22, %v669_v20  ;;  %v1623_v4 = vadd.f32 %v1622_v59, %v1621_v62  ;;  %v1801_v5 = vmul.f32 0.03125, %v1800_v7  ;;  %v1992_v23 = vrot.slane %v1991_v47, 1 }
 0x1be   : > { %v694_v16 = vmul.f32 %v3602_v61, %v670_v45  ;;  %v885_v52 = vmul.f32 %v3603_v57, %v865_v42  ;;  %v886_v10 = vmul.f32 %v3604_v30, %v866_v43  ;;  %v1432_v15 = vadd.f32 %v1431_v31, %v1430_v46 }
 0x1bf   : > { %v1624_v39 = vrot.slane %v1623_v4, 1  ;;  %v3397_v36 = vsub.f32 %v3290_v26, %v1801_v5  ;;  %v3400_v55 = vsub.f32 %v3292_v17, %v1801_v5  ;;  %v3403_v58 = vsub.f32 %v3300_v24, %v1801_v5  ;;  %v3607_v24 = vld [vmem:[#allocation13_spill] sm:$0xff] }
 0x1c0   : > { %v695_v63 = vmul.f32 %v3605_v25, %v671_v34  ;;  %v887_v20 = vmul.f32 %v3606_v48, %v867_v56  ;;  %v1433_v62 = vmul.f32 0.03125, %v1432_v15  ;;  %v1993_v49 = vadd.f32 %v1992_v23, %v1991_v47 }
 0x1c1   : > { %v2439_v28 = vpop.eup %2438  ;;  %v1625_v45 = vadd.f32 %v1624_v39, %v1623_v4  ;;  %v3408_v42 = vsub.f32 %v3326_v6, %v1801_v5  ;;  %v1806_v26 = vmul.f32 %v3397_v36, %v3397_v36  ;;  %v1807_v17 = vmul.f32 %v3400_v55, %v3400_v55  ;;  %v3417_v6 = vpop.permute.xlu1 %1457  ;;  %v3608_v4 = vld [vmem:[#allocation18_spill] sm:$0xff] }
 0x1c2   : > { %v696_v43 = vadd.f32 %v693_v51, %v692_v54  ;;  %v888_v46 = vmul.f32 %v3607_v24, %v868_v44  ;;  %v1434_v59 = vadd.f32 1e-05, %v1433_v62  ;;  %v1994_v34 = vmul.f32 0.03125, %v1993_v49 }
 0x1c3   : > { %v2441_v7 = vpop.eup %2440  ;;  %v889_v56 = vadd.f32 %v886_v10, %v885_v52  ;;  %v1626_v31 = vmul.f32 0.03125, %v1625_v45  ;;  %v1808_v47 = vmul.f32 %v3403_v58, %v3403_v58  ;;  %v1810_v22 = vadd.f32 %v1807_v17, %v1806_v26  ;;  %v3609_v10 = vld [vmem:[#allocation21_spill] sm:$0xff] }
 0x1c4   : > { %v1052_v5 = vmul.f32 %v2439_v28, %v3608_v4  ;;  %2442 = vrsqrt.f32 %v1434_v59  ;;  %v3421_v23 = vsub.f32 %v3324_v32, %v1994_v34  ;;  %v3424_v54 = vsub.f32 %v3322_v8, %v1994_v34  ;;  %v3611_v17 = vld [vmem:[#allocation17_spill] sm:$0xff]  ;;  %v3612_v59 = vld [vmem:[#allocation19_spill] sm:$0xff] }
 0x1c5   : > { %v1627_v44 = vadd.f32 1e-05, %v1626_v31  ;;  %v1809_v51 = vmul.f32 %v3408_v42, %v3408_v42  ;;  %v1811_v61 = vadd.f32 %v1810_v22, %v1808_v47  ;;  %v3429_v57 = vsub.f32 %v3337_v53, %v1994_v34  ;;  %v3446_v31 = vpop.permute.xlu1 %1646 }
 0x1c6   : > { %v3432_v52 = vsub.f32 %v3351_v2, %v1994_v34  ;;  %v1999_v30 = vmul.f32 %v3421_v23, %v3421_v23  ;;  %v2000_v32 = vmul.f32 %v3424_v54, %v3424_v54  ;;  %v1244_v8 = vmul.f32 %v2441_v7, %v3609_v10  ;;  %v3610_v2 = vld [vmem:[#allocation16_spill] sm:$0xff] }
 0x1c7   : > { %v697_v15 = vadd.f32 %v696_v43, %v694_v16  ;;  %v890_v39 = vadd.f32 %v889_v56, %v887_v20  ;;  %2444 = vrsqrt.f32 %v1627_v44  ;;  %v1812_v25 = vadd.f32 %v1811_v61, %v1809_v51 }
 0x1c8   : > { %v1056_v48 = vmul.f32 %v1052_v5, %v3065_v38  ;;  %v2001_v53 = vmul.f32 %v3429_v57, %v3429_v57  ;;  %v2003_v62 = vadd.f32 %v2000_v32, %v1999_v30  ;;  %v1050_v49 = vmul.f32 %v2439_v28, %v3610_v2  ;;  %v1257_v5 = vpop.permute.xlu0 %1256 }
 0x1c9   : > { %v1813_v45 = vrot.slane %v1812_v25, 4  ;;  %v1248_v26 = vmul.f32 %v1244_v8, %v3043_v33  ;;  %v1051_v24 = vmul.f32 %v2439_v28, %v3611_v17  ;;  %v1053_v34 = vmul.f32 %v2439_v28, %v3612_v59  ;;  %v3613_v8 = vld [vmem:[#allocation20_spill] sm:$0xff] }
 0x1ca   : > { %v2002_v16 = vmul.f32 %v3432_v52, %v3432_v52  ;;  %v2004_v20 = vadd.f32 %v2003_v62, %v2001_v53  ;;  %v1054_v43 = vmul.f32 %v1050_v49, %v3063_v11  ;;  %v698_v56 = vadd.f32 %v697_v15, %v695_v63 }
 0x1cb   : > { %v891_v47 = vadd.f32 %v890_v39, %v888_v46  ;;  %v1814_v22 = vadd.f32 %v1813_v45, %v1812_v25  ;;  %v1055_v4 = vmul.f32 %v1051_v24, %v3043_v33  ;;  %v1057_v51 = vmul.f32 %v1053_v34, %v3047_v27  ;;  %v3614_v46 = vld [vmem:[#allocation14_spill] sm:$0xff]  ;;  %v3616_v45 = vld [vmem:[#allocation11_spill] sm:$0xff]  ;;  %v3463_v24 = vpop.permute.xlu1 %1461 }
 0x1cc   : > { %v2005_v44 = vadd.f32 %v2004_v20, %v2002_v16  ;;  %v1058_v61 = vadd.f32 %v1054_v43, %v3067_v14  ;;  %v1060_v28 = vadd.f32 %v1056_v48, %v3071_v19  ;;  %v1252_v32 = vadd.f32 %v1248_v26, %v3053_v29  ;;  %v3615_v25 = vld [vmem:[#allocation22_spill] sm:$0xff]  ;;  %v3617_v34 = vld [vmem:[#allocation15_spill] sm:$0xff] }
 0x1cd   : > { %v1815_v30 = vrot.slane %v1814_v22, 2  ;;  %v1059_v10 = vadd.f32 %v1055_v4, %v3053_v29  ;;  %v1243_v53 = vmul.f32 %v2441_v7, %v3613_v8  ;;  %v1246_v39 = vmul.f32 %v2441_v7, %v3274_v3 }
 0x1ce   : > { %v2006_v63 = vrot.slane %v2005_v44, 4  ;;  %v1078_v15 = vmul.f32 %v3614_v46, %v1058_v61  ;;  %v1245_v62 = vmul.f32 %v2441_v7, %v3615_v25  ;;  %v699_v2 = vrot.slane %v698_v56, 4  ;;  %v1265_v61 = vpop.permute.xlu0 %1264 }
 0x1cf   : > { %v1816_v49 = vadd.f32 %v1815_v30, %v1814_v22  ;;  %v1079_v17 = vmul.f32 %v3616_v45, %v1059_v10  ;;  %v1247_v48 = vmul.f32 %v1243_v53, %v3063_v11  ;;  %v1061_v59 = vadd.f32 %v1057_v51, %v3057_v40 }
 0x1d0   : > { %v2007_v26 = vadd.f32 %v2006_v63, %v2005_v44  ;;  %v1080_v16 = vmul.f32 %v3617_v34, %v1060_v28  ;;  %v1249_v20 = vmul.f32 %v1245_v62, %v3065_v38  ;;  %v1272_v3 = vmul.f32 %v3339_v1, %v1252_v32 }
 0x1d1   : > { %v2443_v43 = vpop.eup %2442  ;;  %v1817_v4 = vrot.slane %v1816_v49, 1  ;;  %v1082_v7 = vadd.f32 %v1079_v17, %v1078_v15  ;;  %v1251_v22 = vadd.f32 %v1247_v48, %v3067_v14  ;;  %v1250_v8 = vmul.f32 %v1246_v39, %v3047_v27  ;;  %v3477_v48 = vpop.permute.xlu1 %1835 }
 0x1d2   : > { %v2008_v30 = vrot.slane %v2007_v26, 2  ;;  %v1436_v10 = vmul.f32 %v2443_v43, %v3295_v0  ;;  %v1438_v44 = vmul.f32 %v2443_v43, %v3320_v50  ;;  %v1253_v63 = vadd.f32 %v1249_v20, %v3071_v19  ;;  %v1454_v39 = vpop.permute.xlu0 %1453 }
 0x1d3   : > { %v1818_v51 = vadd.f32 %v1817_v4, %v1816_v49  ;;  %v1083_v53 = vadd.f32 %v1082_v7, %v1080_v16  ;;  %v1271_v28 = vmul.f32 %v1257_v5, %v1251_v22  ;;  %v892_v25 = vrot.slane %v891_v47, 4 }
 0x1d4   : > { %v2445_v46 = vpop.eup %2444  ;;  %v2009_v62 = vadd.f32 %v2008_v30, %v2007_v26  ;;  %v700_v1 = vadd.f32 %v699_v2, %v698_v56  ;;  %v1081_v32 = vmul.f32 %v3367_v37, %v1061_v59  ;;  %v1440_v45 = vmul.f32 %v1436_v10, %v3063_v11 }
 0x1d5   : > { %v1819_v15 = vmul.f32 0.03125, %v1818_v51  ;;  %v1275_v17 = vadd.f32 %v1272_v3, %v1271_v28  ;;  %v1630_v0 = vmul.f32 %v2445_v46, %v3315_v12  ;;  %v1254_v5 = vadd.f32 %v1250_v8, %v3057_v40 }
 0x1d6   : > { %v2010_v50 = vrot.slane %v2009_v62, 1  ;;  %v1442_v49 = vmul.f32 %v1438_v44, %v3065_v38  ;;  %v1084_v16 = vadd.f32 %v1083_v53, %v1081_v32  ;;  %v1273_v2 = vmul.f32 %v1265_v61, %v1253_v63  ;;  %v1655_v44 = vpop.permute.xlu1 %1654 }
 0x1d7   : > { %v1820_v34 = vadd.f32 1e-05, %v1819_v15  ;;  %v1634_v56 = vmul.f32 %v1630_v0, %v3043_v33  ;;  %v893_v26 = vadd.f32 %v892_v25, %v891_v47  ;;  %v1439_v59 = vmul.f32 %v2443_v43, %v3330_v9  ;;  %v1643_v47 = vpop.permute.xlu0 %1642 }
 0x1d8   : > { %v2011_v37 = vadd.f32 %v2010_v50, %v2009_v62  ;;  %v701_v20 = vrot.slane %v700_v1, 2  ;;  %v1444_v12 = vadd.f32 %v1440_v45, %v3067_v14  ;;  %v1276_v4 = vadd.f32 %v1275_v17, %v1273_v2 }
 0x1d9   : > { %2446 = vrsqrt.f32 %v1820_v34  ;;  %v1638_v7 = vadd.f32 %v1634_v56, %v3053_v29  ;;  %v1437_v22 = vmul.f32 %v2443_v43, %v3298_v21  ;;  %v1629_v30 = vmul.f32 %v2445_v46, %v3312_v60 }
 0x1da   : > { %v2012_v3 = vmul.f32 0.03125, %v2011_v37  ;;  %v1085_v10 = vrot.slane %v1084_v16, 4  ;;  %v1274_v8 = vmul.f32 %v3391_v35, %v1254_v5  ;;  %v1446_v61 = vadd.f32 %v1442_v49, %v3071_v19 }
 0x1db   : > { %v1632_v9 = vmul.f32 %v2445_v46, %v3347_v41  ;;  %v1443_v53 = vmul.f32 %v1439_v59, %v3047_v27  ;;  %v1441_v28 = vmul.f32 %v1437_v22, %v3043_v33  ;;  %v1633_v63 = vmul.f32 %v1629_v30, %v3063_v11  ;;  %v1651_v49 = vpop.permute.xlu0 %1650 }
 0x1dc   : > { %v2013_v51 = vadd.f32 1e-05, %v2012_v3  ;;  %v1464_v21 = vmul.f32 %v3377_v18, %v1444_v12  ;;  %v1277_v43 = vadd.f32 %v1276_v4, %v1274_v8  ;;  %v1631_v35 = vmul.f32 %v2445_v46, %v3344_v13  ;;  %v1844_v46 = vpop.permute.xlu1 %1843 }
 0x1dd   : > { %v1636_v60 = vmul.f32 %v1632_v9, %v3047_v27  ;;  %v1658_v25 = vmul.f32 %v3446_v31, %v1638_v7  ;;  %v1445_v62 = vadd.f32 %v1441_v28, %v3053_v29  ;;  %v1637_v41 = vadd.f32 %v1633_v63, %v3067_v14 }
 0x1de   : > { %2448 = vrsqrt.f32 %v2013_v51  ;;  %v1635_v32 = vmul.f32 %v1631_v35, %v3065_v38  ;;  %v894_v15 = vrot.slane %v893_v26, 2  ;;  %v1447_v45 = vadd.f32 %v1443_v53, %v3057_v40 }
 0x1df   : > { %v1465_v17 = vmul.f32 %v1454_v39, %v1445_v62  ;;  %v1657_v0 = vmul.f32 %v1643_v47, %v1637_v41  ;;  %v702_v18 = vadd.f32 %v701_v20, %v700_v1  ;;  %v1086_v50 = vadd.f32 %v1085_v10, %v1084_v16  ;;  %v1840_v16 = vpop.permute.xlu0 %1839 }
 0x1e0   : > { %v1640_v5 = vadd.f32 %v1636_v60, %v3057_v40  ;;  %v1639_v13 = vadd.f32 %v1635_v32, %v3071_v19  ;;  %v1466_v31 = vmul.f32 %v3417_v6, %v1446_v61  ;;  %v1278_v34 = vrot.slane %v1277_v43, 4  ;;  %v2033_v47 = vpop.permute.xlu1 %2032 }
 0x1e1   : > { %v1468_v56 = vadd.f32 %v1465_v17, %v1464_v21  ;;  %v1661_v2 = vadd.f32 %v1658_v25, %v1657_v0  ;;  %v895_v59 = vadd.f32 %v894_v15, %v893_v26  ;;  %v1467_v12 = vmul.f32 %v3463_v24, %v1447_v45 }
 0x1e2   : > { %v1659_v37 = vmul.f32 %v1651_v49, %v1639_v13  ;;  %v1087_v39 = vrot.slane %v1086_v50, 2  ;;  %v1660_v3 = vmul.f32 %v1655_v44, %v1640_v5  ;;  %v703_v7 = vrot.slane %v702_v18, 1 }
 0x1e3   : > { %v1469_v4 = vadd.f32 %v1468_v56, %v1466_v31  ;;  %v1279_v22 = vadd.f32 %v1278_v34, %v1277_v43  ;;  %v896_v26 = vrot.slane %v895_v59, 1  ;;  %v2029_v25 = vpop.permute.xlu0 %2028 }
 0x1e4   : > { %v1662_v1 = vadd.f32 %v1661_v2, %v1659_v37  ;;  %v1088_v51 = vadd.f32 %v1087_v39, %v1086_v50  ;;  %v704_v63 = vadd.f32 %v703_v7, %v702_v18  ;;  %v1848_v50 = vpop.permute.xlu1 %1847 }
 0x1e5   : > { %v1470_v30 = vadd.f32 %v1469_v4, %v1467_v12  ;;  %v1280_v60 = vrot.slane %v1279_v22, 2  ;;  %v897_v45 = vadd.f32 %v896_v26, %v895_v59 }
 0x1e6   : > { %v2447_v20 = vpop.eup %2446  ;;  %v1663_v8 = vadd.f32 %v1662_v1, %v1660_v3  ;;  %v1089_v17 = vrot.slane %v1088_v51, 1 }
 0x1e7   : > { %v1822_v10 = vmul.f32 %v2447_v20, %v3397_v36  ;;  %v1824_v6 = vmul.f32 %v2447_v20, %v3403_v58  ;;  %v1823_v61 = vmul.f32 %v2447_v20, %v3400_v55  ;;  %v1471_v9 = vrot.slane %v1470_v30, 4  ;;  %v2037_v4 = vpop.permute.xlu0 %2036 }
 0x1e8   : > { %v1825_v24 = vmul.f32 %v2447_v20, %v3408_v42  ;;  %v1664_v36 = vrot.slane %v1663_v8, 4  ;;  %v1090_v39 = vadd.f32 %v1089_v17, %v1088_v51 }
 0x1e9   : > { %v1826_v44 = vmul.f32 %v1822_v10, %v3063_v11  ;;  %v1828_v53 = vmul.f32 %v1824_v6, %v3065_v38  ;;  %v1827_v28 = vmul.f32 %v1823_v61, %v3043_v33  ;;  %v1472_v21 = vadd.f32 %v1471_v9, %v1470_v30 }
 0x1ea   : > { %v1829_v43 = vmul.f32 %v1825_v24, %v3047_v27  ;;  %v1665_v5 = vadd.f32 %v1664_v36, %v1663_v8 }
 0x1eb   : > { %v2449_v58 = vpop.eup %2448  ;;  %v1830_v55 = vadd.f32 %v1826_v44, %v3067_v14  ;;  %v1832_v35 = vadd.f32 %v1828_v53, %v3071_v19  ;;  %v1831_v42 = vadd.f32 %v1827_v28, %v3053_v29  ;;  %v1473_v41 = vrot.slane %v1472_v21, 2 }
 0x1ec   : > { %v2017_v62 = vmul.f32 %v2449_v58, %v3429_v57  ;;  %v2016_v32 = vmul.f32 %v2449_v58, %v3424_v54  ;;  %v2015_v15 = vmul.f32 %v2449_v58, %v3421_v23  ;;  %v1833_v31 = vadd.f32 %v1829_v43, %v3057_v40 }
 0x1ed   : > { %v1850_v0 = vmul.f32 %v3477_v48, %v1830_v55  ;;  %v1851_v18 = vmul.f32 %v1840_v16, %v1831_v42  ;;  %v1852_v34 = vmul.f32 %v1844_v46, %v1832_v35  ;;  %v2018_v54 = vmul.f32 %v2449_v58, %v3432_v52  ;;  %v2041_v52 = vpop.permute.xlu1 %2040 }
 0x1ee   : > { %v2020_v49 = vmul.f32 %v2016_v32, %v3043_v33  ;;  %v2019_v13 = vmul.f32 %v2015_v15, %v3063_v11  ;;  %v2021_v56 = vmul.f32 %v2017_v62, %v3065_v38  ;;  %v1281_v23 = vadd.f32 %v1280_v60, %v1279_v22 }
 0x1ef   : > { %v1854_v57 = vadd.f32 %v1851_v18, %v1850_v0  ;;  %v1474_v2 = vadd.f32 %v1473_v41, %v1472_v21  ;;  %v1853_v59 = vmul.f32 %v1848_v50, %v1833_v31  ;;  %v2022_v11 = vmul.f32 %v2018_v54, %v3047_v27 }
 0x1f0   : > { %v2024_v37 = vadd.f32 %v2020_v49, %v3053_v29  ;;  %v2023_v48 = vadd.f32 %v2019_v13, %v3067_v14  ;;  %v2025_v33 = vadd.f32 %v2021_v56, %v3071_v19  ;;  %v1666_v46 = vrot.slane %v1665_v5, 2 }
 0x1f1   : > { %v1855_v12 = vadd.f32 %v1854_v57, %v1852_v34  ;;  %v898_v38 = vadd.f32 %v897_v45, %v704_v63  ;;  %v2026_v20 = vadd.f32 %v2022_v11, %v3057_v40  ;;  %v1282_v7 = vrot.slane %v1281_v23, 1 }
 0x1f2   : > { %v2044_v3 = vmul.f32 %v2033_v47, %v2024_v37  ;;  %v2043_v1 = vmul.f32 %v2029_v25, %v2023_v48  ;;  %v1475_v29 = vrot.slane %v1474_v2, 1  ;;  %v2045_v14 = vmul.f32 %v2037_v4, %v2025_v33 }
 0x1f3   : > { %v1856_v16 = vadd.f32 %v1855_v12, %v1853_v59  ;;  %v1091_v10 = vadd.f32 %v1090_v39, %v898_v38  ;;  %v1667_v8 = vadd.f32 %v1666_v46, %v1665_v5  ;;  %v2046_v19 = vmul.f32 %v2041_v52, %v2026_v20 }
 0x1f4   : > { %v2047_v22 = vadd.f32 %v2044_v3, %v2043_v1  ;;  %v1283_v61 = vadd.f32 %v1282_v7, %v1281_v23  ;;  %v1476_v47 = vadd.f32 %v1475_v29, %v1474_v2  ;;  %v2057_v25 = vstv %s2345_s21 }
 0x1f5   : > { %v1857_v30 = vrot.slane %v1856_v16, 4  ;;  %v1668_v24 = vrot.slane %v1667_v8, 1 }
 0x1f6   : > { %v2048_v6 = vadd.f32 %v2047_v22, %v2045_v14  ;;  %v1284_v44 = vadd.f32 %v1283_v61, %v1091_v10 }
 0x1f7   : > { %v1858_v27 = vadd.f32 %v1857_v30, %v1856_v16  ;;  %v1669_v36 = vadd.f32 %v1668_v24, %v1667_v8 }
 0x1f8   : > { %v2049_v26 = vadd.f32 %v2048_v6, %v2046_v19  ;;  %v1477_v28 = vadd.f32 %v1476_v47, %v1284_v44 }
 0x1f9   : > { %v1859_v9 = vrot.slane %v1858_v27, 2 }
 0x1fa   : > { %v2050_v51 = vrot.slane %v2049_v26, 4  ;;  %v1670_v60 = vadd.f32 %v1669_v36, %v1477_v28 }
 0x1fb   : > { %v1860_v40 = vadd.f32 %v1859_v9, %v1858_v27 }
 0x1fc   : > { %v2051_v53 = vadd.f32 %v2050_v51, %v2049_v26 }
 0x1fd   : > { %v1861_v63 = vrot.slane %v1860_v40, 1 }
 0x1fe   : > { %v2052_v21 = vrot.slane %v2051_v53, 2 }
 0x1ff   : > { %v1862_v43 = vadd.f32 %v1861_v63, %v1860_v40 }
 0x200   : > { %v2053_v58 = vadd.f32 %v2052_v21, %v2051_v53 }
 0x201   : > { %v1863_v55 = vadd.f32 %v1862_v43, %v1670_v60 }
 0x202   : > { %v2054_v35 = vrot.slane %v2053_v58, 1 }
 0x204   : > { %v2055_v42 = vadd.f32 %v2054_v35, %v2053_v58 }
 0x206   : > { %v2056_v62 = vadd.f32 %v2055_v42, %v1863_v55 }
 0x208   : > { %v2058_v41 = vadd.f32 %v2057_v25, %v2056_v62 }
 0x20a   : > { %2059 = vst [vmem:[%s351_s26] sm:$0x1] %v2058_v41 }
 0x20b   : > { %2463 = shalt.err (!%p2460_p3)
}
 0x20c   : > { %s2464_s21 = scalar_lea.hbm %s2071_s30, 16  ;;  %s2468_s26 = scalar_lea.hbm %s3574_s10, 48 }
 0x20d   : > { %p2465_p4 = scmp.ne.s32.totalorder %s2071_s30, %s2464_s21  ;;  %p2469_p9 = scmp.lt.s32.totalorder %s2071_s30, %s3574_s10 }
 0x20e   : > { %p2470_p10 = scmp.lt.s32.totalorder %s2468_s26, %s2464_s21 }
 0x20f   : > { %p2466_p7 = pnand %p2465_p4, %p2617_p5 }
 0x210   : > { %p2471_p11 = por %p2470_p10, %p2469_p9 }
 0x211   : > { %p2467_p8 = pneg %p2466_p7 }
 0x213   : > { %p2472_p12 = pnand %p2471_p11, %p2467_p8 }
 0x215   : > { %2475 = shalt.err (!%p2472_p12)
}
 0x216   : > { %2346 = dma.vmem_to_hbm [thread:$0]  (%p2617_p5), %s2074_s27, 16, %s2071_s30, %s2061_s11  }
 0x217 PF: > { %p2352_p13 = scmp.ge.s32.totalorder %s2510_s18, 2  ;;  %s2085_s12 = sand.u32 1, %s2498_s15  }
 0x218   : > { %s2086_s13 = scalar_lea.sflag [#allocation4], %s2085_s12 }
 0x219   : > { %p2349_p0 = pnand %p2352_p13, %p2621_p6 }
 0x21b   : > { %p2350_p1 = pneg %p2349_p0 }
 0x21d   : > { %2493 = dma.done.wait (%p2350_p1), %s2086_s13, 16  }
 0x21e   : > { %2495 = vsyncadd (%p2350_p1), %s2086_s13, 4294967280  ;;  %p22_p2 = scmp.ge.s32.totalorder %s2604_s20, 5   ;;  %s3618_s15 = smov %s2502_s16 }
 0x21f   : > { %s3619_s16 = smov %s2506_s17  ;;  %s3620_s17 = smov %s2615_s23 }
 0x220   : > { %s3621_s18 = smov %s2604_s20  ;;  %24 = sbr.rel (!%p22_p2) target bundleno = 6 (0x6), region = 95 }
 0x225   :  { %2090 = vsyncpa [#allocation4], 1 }
 0x226   :  { %2092 = vsyncpa [#allocation4 + $0x1], 1 }

</bundles_post_ra>
